<compile_context>
chip_gen: v6e
topology: v6e:2x2x1
jax: 0.10.0
libtpu: 0.0.40
codegen_flags: <defaults>
</compile_context>

<pallas_src>
from functools import partial

import numpy as np

import jax
import jax.numpy as jnp
from jax.experimental import pallas as pl
from jax.experimental.pallas import tpu as pltpu

C_IN = 3     # RGB, required by ImageNet input normalization
C_MID = 16   # channels of the small VGG-style stack

IMAGENET_MEAN = np.array([0.485, 0.456, 0.406], np.float32)
IMAGENET_STD = np.array([0.229, 0.224, 0.225], np.float32)


# ---------------------------------------------------------------------------
# Host-side, one-time weight packing (tiny tensors, plain numpy)
# ---------------------------------------------------------------------------

def _banded_conv_weight(w_oihw, width, pad_cols):
    """Pack a 3x3 'same' conv (torch OIHW weights) into ONE matmul matrix acting on
    rows that stack the 3 kh row-taps along K (channels-last within each tap):

        (M, 3 * (width + 2*pad_cols) * Cin) @ (3 * (width + 2*pad_cols) * Cin, width * Cout)

    pad_cols=1: the input rows carry an explicit 1-pixel column halo.
    pad_cols=0: the column halo is implicit zero padding (edge taps are simply
                omitted from the matrix, which equals multiplying zeros).
    """
    w = np.asarray(w_oihw, np.float32)               # (Cout, Cin, 3, 3)
    cout, cin, kh_sz, kw_sz = w.shape
    k_dim = (width + 2 * pad_cols) * cin
    mats = np.zeros((kh_sz, k_dim, width * cout), np.float32)
    for kh in range(kh_sz):
        for kw in range(kw_sz):
            blk = w[:, :, kh, kw].T                  # (Cin, Cout)
            for wcol in range(width):
                src = wcol + kw - 1 + pad_cols       # column inside the input row
                if 0 <= src < width + 2 * pad_cols:
                    mats[kh,
                         src * cin:(src + 1) * cin,
                         wcol * cout:(wcol + 1) * cout] = blk
    # stack the kh taps along K (kernel concatenates its operands in the same order)
    return jnp.asarray(mats.reshape(kh_sz * k_dim, width * cout))


# ---------------------------------------------------------------------------
# Fused Pallas kernel: conv1(+folded norm)+relu1 -> conv2+relu2, B_blk images/step
# ---------------------------------------------------------------------------

def _make_fused_kernel(B, H, W, c_in, cm, need_r1, need_r2, out_dtype):
    wcm = W * cm
    kin3 = 3 * (W + 2) * c_in
    M = B * H

    def kernel(*args):
        # argument layout (static, chosen by the wrapper):
        #   xs, w1, b1 [, w2, b2], out_relu1?, out_relu2? [, pad_scratch]
        if need_r2:
            xs_ref, w1_ref, b1_ref, w2_ref, b2_ref = args[:5]
            rest = args[5:]
            pad_ref = rest[-1]            # VMEM (B, H+2, W*cm): conv2 row halo
            out_refs = rest[:-1]
        else:
            xs_ref, w1_ref, b1_ref = args[:3]
            out_refs = args[3:]

        # ---- conv1 (+ folded input norm) + bias + ReLU : one long-K MXU matmul ----
        # xs_ref: (B, H, 3*(W+2)*c_in)  kh-stacked, mean-padded, channels-last rows
        a1 = xs_ref[...].reshape(M, kin3)
        y1 = jnp.dot(a1, w1_ref[...], preferred_element_type=jnp.float32)
        y1 = jnp.maximum(y1 + b1_ref[...], 0.0)              # (M, W*cm), f32

        oi = 0
        if need_r1:
            out_refs[oi][...] = y1.reshape(B, H, wcm).astype(out_dtype)
            oi += 1

        if need_r2:
            # ---- conv2's 1-row zero halo lives entirely in VMEM (no HBM trip) ----
            # NOTE: zero rows are written every step (2 tiny stores) on purpose:
            # scratch is per-TensorCore, so gating on program_id==0 would leave the
            # second core's halo uninitialized under megacore grid splitting.
            zrow = jnp.zeros((B, 1, wcm), jnp.float32)
            pad_ref[:, 0:1, :] = zrow
            pad_ref[:, H + 1:H + 2, :] = zrow
            pad_ref[:, 1:H + 1, :] = y1.reshape(B, H, wcm)

            # ---- conv2 + bias + ReLU : one long-K MXU matmul (K = 3*W*cm) ----
            # Lane-aligned concat (each piece is W*cm = multiple of 128 lanes).
            a2 = jnp.concatenate(
                [pad_ref[:, kh:kh + H, :].reshape(M, wcm) for kh in range(3)],
                axis=-1)                                      # (M, 3*W*cm)
            y2 = jnp.dot(a2, w2_ref[...], preferred_element_type=jnp.float32)
            y2 = jnp.maximum(y2 + b2_ref[...], 0.0)
            out_refs[oi][...] = y2.reshape(B, H, wcm).astype(out_dtype)

    return kernel


# ---------------------------------------------------------------------------
# jitted wrapper around the pallas_call (input pad/stack + NCHW conversion fused)
# ---------------------------------------------------------------------------

@partial(jax.jit, static_argnames=("H", "W", "cm", "b_blk", "need_r1", "need_r2",
                                   "use_input_norm", "feat_dtype"))
def _fused_forward(x_nchw, w1m, b1r, w2m, b2r, *, H, W, cm, b_blk,
                   need_r1, need_r2, use_input_norm, feat_dtype):
    out_dtype = jnp.dtype(feat_dtype)
    N, c_in = x_nchw.shape[0], x_nchw.shape[1]
    wcm = W * cm
    kin3 = 3 * (W + 2) * c_in

    # Channels-last rows with a 1-pixel column/row halo.  Pad value = per-channel
    # mean so the norm-folded conv1 sees (mean - mean)/std == 0 at borders, exactly
    # matching zero padding applied AFTER normalization.
    pad_val = (jnp.asarray(IMAGENET_MEAN) if use_input_norm
               else jnp.zeros((c_in,), jnp.float32))
    x_nhwc = jnp.transpose(x_nchw, (0, 2, 3, 1)).astype(jnp.float32)
    xp = jnp.broadcast_to(pad_val, (N, H + 2, W + 2, c_in))
    xp = xp.at[:, 1:H + 1, 1:W + 1, :].set(x_nhwc)
    xp = xp.reshape(N, H + 2, (W + 2) * c_in)
    # Stack the 3 kh row-taps along K (row-only im2col of the tiny 3-ch input).
    xs = jnp.concatenate([xp[:, kh:kh + H, :] for kh in range(3)], axis=-1)

    in_arrays = [xs, w1m, b1r]
    in_specs = [
        pl.BlockSpec((b_blk, H, kin3), lambda n: (n, 0, 0)),
        pl.BlockSpec(w1m.shape, lambda n: (0, 0)),      # resident weights
        pl.BlockSpec(b1r.shape, lambda n: (0, 0)),
    ]
    scratch_shapes = []
    if need_r2:
        in_arrays += [w2m, b2r]
        in_specs += [
            pl.BlockSpec(w2m.shape, lambda n: (0, 0)),
            pl.BlockSpec(b2r.shape, lambda n: (0, 0)),
        ]
        scratch_shapes.append(pltpu.VMEM((b_blk, H + 2, wcm), jnp.float32))

    out_sds = jax.ShapeDtypeStruct((N, H, wcm), out_dtype)
    out_spec = pl.BlockSpec((b_blk, H, wcm), lambda n: (n, 0, 0))
    n_out = int(need_r1) + int(need_r2)

    kernel = _make_fused_kernel(b_blk, H, W, c_in, cm, need_r1, need_r2, out_dtype)
    outs = pl.pallas_call(
        kernel,
        out_shape=tuple([out_sds] * n_out),
        grid_spec=pltpu.PrefetchScalarGridSpec(
            num_scalar_prefetch=0,
            grid=(N // b_blk,),                          # B_blk images per grid step
            in_specs=in_specs,
            out_specs=[out_spec] * n_out,
            scratch_shapes=scratch_shapes,
        ),
        compiler_params=pltpu.CompilerParams(
            dimension_semantics=("parallel",),           # batch split across TCs (v7x)
            vmem_limit_bytes=32 * 1024 * 1024,           # well under v7x's 64 MiB
        ),
    )(*in_arrays)
    if not isinstance(outs, (tuple, list)):
        outs = (outs,)

    # back to torch-style NCHW features, still inside the same jit
    result = {}
    idx = 0
    if need_r1:
        result['relu1'] = jnp.transpose(outs[idx].reshape(N, H, W, cm), (0, 3, 1, 2))
        idx += 1
    if need_r2:
        result['relu2'] = jnp.transpose(outs[idx].reshape(N, H, W, cm), (0, 3, 1, 2))
    return result


# ---------------------------------------------------------------------------
# Public wrapper mirroring _BasePerceptualModel.forward
# ---------------------------------------------------------------------------

def make_params(key, c_in=C_IN, c_mid=C_MID):
    k1, k2, k3, k4 = jax.random.split(key, 4)
    return {
        'w1': 0.1 * jax.random.normal(k1, (c_mid, c_in, 3, 3), jnp.float32),
        'b1': 0.1 * jax.random.normal(k2, (c_mid,), jnp.float32),
        'w2': 0.1 * jax.random.normal(k3, (c_mid, c_mid, 3, 3), jnp.float32),
        'b2': 0.1 * jax.random.normal(k4, (c_mid,), jnp.float32),
    }


def _default_feature_dtype():
    """bf16 feature storage on chips with native bf16 VPU paths (v6e / v7x);
    keep f32 on v5e / older (no bf16 VALU -> pack/unpack overhead)."""
    try:
        kind = jax.devices()[0].device_kind.lower()
    except Exception:
        return "float32"
    if any(tag in kind for tag in ("v6", "v7", "tpu7")):
        return "bfloat16"
    return "float32"


def _pick_block_batch(N, H):
    """Images per grid step: fill the MXU M dimension (target ~256 rows) while
    keeping >=2 grid steps whenever possible so both v7x TensorCores get work."""
    target_m = 256
    divisors = [d for d in range(1, N + 1) if N % d == 0]
    fits = [d for d in divisors if d * H <= target_m] or [1]
    multi = [d for d in fits if N // d >= 2]
    return max(multi) if multi else max(fits)


def perceptual_forward(x_nchw, params, layer_name_list, use_input_norm=True,
                       feature_dtype=None):
    """Mirrors _BasePerceptualModel.forward: returns {layer_name: feature (NCHW)}."""
    assert set(layer_name_list) <= {'relu1', 'relu2'} and len(layer_name_list) > 0
    N, C, H, W = x_nchw.shape
    assert C == C_IN
    cm = params['w1'].shape[0]
    need_r1 = 'relu1' in layer_name_list
    need_r2 = 'relu2' in layer_name_list
    if feature_dtype is None:
        feature_dtype = _default_feature_dtype()
    feat_dtype = jnp.dtype(feature_dtype).name

    # ----- one-time host-side packing of the tiny weights -----
    w1 = np.asarray(params['w1'], np.float32)        # (cm, 3, 3, 3) OIHW
    b1 = np.asarray(params['b1'], np.float32)
    if use_input_norm:
        # Fold (x - mean)/std into conv1; border exactness is preserved by the
        # mean-valued input padding built inside _fused_forward.
        w1_eff = w1 / IMAGENET_STD[None, :, None, None]
        b1_eff = b1 - np.einsum('oihw,i->o', w1, IMAGENET_MEAN / IMAGENET_STD)
    else:
        w1_eff, b1_eff = w1, b1

    w1m = _banded_conv_weight(w1_eff, W, pad_cols=1)   # (3*(W+2)*C_IN, W*cm)
    b1r = jnp.asarray(np.tile(b1_eff, W)[None, :])     # (1, W*cm)
    if need_r2:
        w2 = np.asarray(params['w2'], np.float32)
        b2 = np.asarray(params['b2'], np.float32)
        w2m = _banded_conv_weight(w2, W, pad_cols=0)   # (3*W*cm, W*cm)
        b2r = jnp.asarray(np.tile(b2, W)[None, :])     # (1, W*cm)
    else:
        w2m, b2r = None, None                          # conv2 skipped entirely

    b_blk = _pick_block_batch(N, H)

    # keep module order (relu1 before relu2), like torch's named_children iteration
    feats = _fused_forward(x_nchw, w1m, b1r, w2m, b2r,
                           H=H, W=W, cm=cm, b_blk=b_blk,
                           need_r1=need_r1, need_r2=need_r2,
                           use_input_norm=use_input_norm,
                           feat_dtype=feat_dtype)
    return {name: feats[name] for name in ('relu1', 'relu2') if name in feats}


# ---------------------------------------------------------------------------
# Pure-JAX reference (lax conv) for a silent correctness check
# ---------------------------------------------------------------------------

def _reference_forward(x_nchw, params, layer_name_list):
    mean = jnp.asarray(IMAGENET_MEAN).reshape(1, 3, 1, 1)
    std = jnp.asarray(IMAGENET_STD).reshape(1, 3, 1, 1)
    x = (x_nchw - mean) / std
    out = {}

    def conv(x, w, b):
        y = jax.lax.conv_general_dilated(
            x, w, window_strides=(1, 1), padding=((1, 1), (1, 1)),
            dimension_numbers=('NCHW', 'OIHW', 'NCHW'))
        return y + b.reshape(1, -1, 1, 1)

    x = conv(x, params['w1'], params['b1'])
    x = jnp.maximum(x, 0.0)
    if 'relu1' in layer_name_list:
        out['relu1'] = x
    x = conv(x, params['w2'], params['b2'])
    x = jnp.maximum(x, 0.0)
    if 'relu2' in layer_name_list:
        out['relu2'] = x
    return out


if __name__ == "__main__":
    key = jax.random.PRNGKey(0)
    k_x, k_p = jax.random.split(key)

    # batch=8 so image-batched blocks (B_blk=4 -> M=64) still leave >=2 grid steps;
    # channels=3 (RGB, required by ImageNet input norm), spatial 16x16.
    x = jax.random.normal(k_x, (8, 3, 16, 16), jnp.float32)
    params = make_params(k_p)
    layer_name_list = ['relu1', 'relu2']

    feats = perceptual_forward(x, params, layer_name_list, use_input_norm=True)
    feats = jax.tree_util.tree_map(jax.block_until_ready, feats)

    # silent numerical check against a pure-JAX reference
    ref = _reference_forward(x, params, layer_name_list)
    is_bf16 = any(jnp.dtype(v.dtype) == jnp.dtype(jnp.bfloat16) for v in feats.values())
    tol = 1e-2 if is_bf16 else 2e-3
    for name in layer_name_list:
        assert feats[name].shape == ref[name].shape, name
        got = feats[name].astype(jnp.float32)
        assert jnp.allclose(got, ref[name], atol=tol, rtol=tol), name

    print("KERNEL_OK")
</pallas_src>

<mosaic_0001>
module attributes {stable_mosaic.version = 11 : i64} {
  func.func @kernel(%arg0: i32, %arg1: memref<4x16x162xf32, #tpu.memory_space<vmem>>, %arg2: memref<162x256xf32, #tpu.memory_space<vmem>>, %arg3: memref<1x256xf32, #tpu.memory_space<vmem>>, %arg4: memref<768x256xf32, #tpu.memory_space<vmem>>, %arg5: memref<1x256xf32, #tpu.memory_space<vmem>>, %arg6: memref<4x16x256xf32, #tpu.memory_space<vmem>>, %arg7: memref<4x16x256xf32, #tpu.memory_space<vmem>>, %arg8: memref<4x18x256xf32, #tpu.memory_space<vmem>>) attributes {dimension_semantics = [#tpu.dimension_semantics<parallel>], iteration_bounds = array<i64: 2>, scalar_prefetch = 0 : i64, scratch_operands = 1 : i64, tpu.core_type = #tpu.core_type<tc>, window_params = [{transform_indices = @transform_0, window_bounds = array<i64: 4, 16, 162>}, {pipeline_mode = #tpu.pipeline_mode<synchronous>, transform_indices = @transform_1, window_bounds = array<i64: 162, 256>}, {pipeline_mode = #tpu.pipeline_mode<synchronous>, transform_indices = @transform_2, window_bounds = array<i64: 1, 256>}, {pipeline_mode = #tpu.pipeline_mode<synchronous>, transform_indices = @transform_3, window_bounds = array<i64: 768, 256>}, {pipeline_mode = #tpu.pipeline_mode<synchronous>, transform_indices = @transform_4, window_bounds = array<i64: 1, 256>}, {transform_indices = @transform_5, window_bounds = array<i64: 4, 16, 256>}, {transform_indices = @transform_6, window_bounds = array<i64: 4, 16, 256>}]} {
    %c0 = arith.constant 0 : index
    %c0_0 = arith.constant 0 : index
    %c0_1 = arith.constant 0 : index
    %0 = vector.load %arg1[%c0, %c0_0, %c0_1] : memref<4x16x162xf32, #tpu.memory_space<vmem>>, vector<4x16x162xf32>
    %1 = vector.shape_cast %0 : vector<4x16x162xf32> to vector<64x162xf32>
    %c0_2 = arith.constant 0 : index
    %c0_3 = arith.constant 0 : index
    %2 = vector.load %arg2[%c0_2, %c0_3] : memref<162x256xf32, #tpu.memory_space<vmem>>, vector<162x256xf32>
    %cst = arith.constant dense<0.000000e+00> : vector<64x256xf32>
    %3 = tpu.matmul %1, %2, %cst {dimension_numbers = #tpu.dot_dimension_numbers<[1], [0], [0], [1], [0, 0, 1, 1], [], []>} : vector<64x162xf32>, vector<162x256xf32>, vector<64x256xf32> -> vector<64x256xf32>
    %c0_4 = arith.constant 0 : index
    %c0_5 = arith.constant 0 : index
    %4 = vector.load %arg3[%c0_4, %c0_5] : memref<1x256xf32, #tpu.memory_space<vmem>>, vector<1x256xf32>
    %5 = vector.broadcast %4 : vector<1x256xf32> to vector<64x256xf32>
    %6 = arith.addf %3, %5 : vector<64x256xf32>
    %cst_6 = arith.constant 0.000000e+00 : f32
    %7 = vector.broadcast %cst_6 : f32 to vector<64x256xf32>
    %8 = arith.maximumf %6, %7 : vector<64x256xf32>
    %9 = vector.shape_cast %8 : vector<64x256xf32> to vector<4x16x256xf32>
    %c0_7 = arith.constant 0 : index
    %c0_8 = arith.constant 0 : index
    %c0_9 = arith.constant 0 : index
    %10 = vector.load %arg6[%c0_7, %c0_8, %c0_9] : memref<4x16x256xf32, #tpu.memory_space<vmem>>, vector<4x16x256xf32>
    tpu.vector_store %arg6[%c0_7, %c0_8, %c0_9], %9 {strides = array<i32>} : memref<4x16x256xf32, #tpu.memory_space<vmem>>, vector<4x16x256xf32>,
    %cst_10 = arith.constant 0.000000e+00 : f32
    %11 = vector.broadcast %cst_10 : f32 to vector<4x1x256xf32>
    %c0_11 = arith.constant 0 : index
    %c0_12 = arith.constant 0 : index
    %c0_13 = arith.constant 0 : index
    %12 = vector.load %arg8[%c0_11, %c0_12, %c0_13] : memref<4x18x256xf32, #tpu.memory_space<vmem>>, vector<4x1x256xf32>
    tpu.vector_store %arg8[%c0_11, %c0_12, %c0_13], %11 {strides = array<i32>} : memref<4x18x256xf32, #tpu.memory_space<vmem>>, vector<4x1x256xf32>,
    %c0_14 = arith.constant 0 : index
    %c17 = arith.constant 17 : index
    %c0_15 = arith.constant 0 : index
    %13 = vector.load %arg8[%c0_14, %c17, %c0_15] : memref<4x18x256xf32, #tpu.memory_space<vmem>>, vector<4x1x256xf32>
    tpu.vector_store %arg8[%c0_14, %c17, %c0_15], %11 {strides = array<i32>} : memref<4x18x256xf32, #tpu.memory_space<vmem>>, vector<4x1x256xf32>,
    %14 = vector.shape_cast %8 : vector<64x256xf32> to vector<4x16x256xf32>
    %c0_16 = arith.constant 0 : index
    %c1 = arith.constant 1 : index
    %c0_17 = arith.constant 0 : index
    %15 = vector.load %arg8[%c0_16, %c1, %c0_17] : memref<4x18x256xf32, #tpu.memory_space<vmem>>, vector<4x16x256xf32>
    tpu.vector_store %arg8[%c0_16, %c1, %c0_17], %14 {strides = array<i32>} : memref<4x18x256xf32, #tpu.memory_space<vmem>>, vector<4x16x256xf32>,
    %c0_18 = arith.constant 0 : index
    %c0_19 = arith.constant 0 : index
    %c0_20 = arith.constant 0 : index
    %16 = vector.load %arg8[%c0_18, %c0_19, %c0_20] : memref<4x18x256xf32, #tpu.memory_space<vmem>>, vector<4x16x256xf32>
    %17 = vector.shape_cast %16 : vector<4x16x256xf32> to vector<64x256xf32>
    %c0_21 = arith.constant 0 : index
    %c1_22 = arith.constant 1 : index
    %c0_23 = arith.constant 0 : index
    %18 = vector.load %arg8[%c0_21, %c1_22, %c0_23] : memref<4x18x256xf32, #tpu.memory_space<vmem>>, vector<4x16x256xf32>
    %19 = vector.shape_cast %18 : vector<4x16x256xf32> to vector<64x256xf32>
    %c0_24 = arith.constant 0 : index
    %c2 = arith.constant 2 : index
    %c0_25 = arith.constant 0 : index
    %20 = vector.load %arg8[%c0_24, %c2, %c0_25] : memref<4x18x256xf32, #tpu.memory_space<vmem>>, vector<4x16x256xf32>
    %21 = vector.shape_cast %20 : vector<4x16x256xf32> to vector<64x256xf32>
    %22 = tpu.concatenate %17, %19, %21 in 1 : vector<64x256xf32>, vector<64x256xf32>, vector<64x256xf32> -> vector<64x768xf32>
    %c0_26 = arith.constant 0 : index
    %c0_27 = arith.constant 0 : index
    %23 = vector.load %arg4[%c0_26, %c0_27] : memref<768x256xf32, #tpu.memory_space<vmem>>, vector<768x256xf32>
    %cst_28 = arith.constant dense<0.000000e+00> : vector<64x256xf32>
    %24 = tpu.matmul %22, %23, %cst_28 {dimension_numbers = #tpu.dot_dimension_numbers<[1], [0], [0], [1], [0, 0, 1, 1], [], []>} : vector<64x768xf32>, vector<768x256xf32>, vector<64x256xf32> -> vector<64x256xf32>
    %c0_29 = arith.constant 0 : index
    %c0_30 = arith.constant 0 : index
    %25 = vector.load %arg5[%c0_29, %c0_30] : memref<1x256xf32, #tpu.memory_space<vmem>>, vector<1x256xf32>
    %26 = vector.broadcast %25 : vector<1x256xf32> to vector<64x256xf32>
    %27 = arith.addf %24, %26 : vector<64x256xf32>
    %cst_31 = arith.constant 0.000000e+00 : f32
    %28 = vector.broadcast %cst_31 : f32 to vector<64x256xf32>
    %29 = arith.maximumf %27, %28 : vector<64x256xf32>
    %30 = vector.shape_cast %29 : vector<64x256xf32> to vector<4x16x256xf32>
    %c0_32 = arith.constant 0 : index
    %c0_33 = arith.constant 0 : index
    %c0_34 = arith.constant 0 : index
    %31 = vector.load %arg7[%c0_32, %c0_33, %c0_34] : memref<4x16x256xf32, #tpu.memory_space<vmem>>, vector<4x16x256xf32>
    tpu.vector_store %arg7[%c0_32, %c0_33, %c0_34], %30 {strides = array<i32>} : memref<4x16x256xf32, #tpu.memory_space<vmem>>, vector<4x16x256xf32>,
    return
  }
  func.func @transform_0(%arg0: i32) -> (i32, i32, i32) {
    %c0_i32 = arith.constant 0 : i32
    %c0_i32_0 = arith.constant 0 : i32
    %c0_i32_1 = arith.constant 0 : i32
    return %arg0, %c0_i32, %c0_i32_0 : i32, i32, i32
  }
  func.func @transform_1(%arg0: i32) -> (i32, i32) {
    %c0_i32 = arith.constant 0 : i32
    %c0_i32_0 = arith.constant 0 : i32
    %c0_i32_1 = arith.constant 0 : i32
    return %c0_i32, %c0_i32_0 : i32, i32
  }
  func.func @transform_2(%arg0: i32) -> (i32, i32) {
    %c0_i32 = arith.constant 0 : i32
    %c0_i32_0 = arith.constant 0 : i32
    %c0_i32_1 = arith.constant 0 : i32
    return %c0_i32, %c0_i32_0 : i32, i32
  }
  func.func @transform_3(%arg0: i32) -> (i32, i32) {
    %c0_i32 = arith.constant 0 : i32
    %c0_i32_0 = arith.constant 0 : i32
    %c0_i32_1 = arith.constant 0 : i32
    return %c0_i32, %c0_i32_0 : i32, i32
  }
  func.func @transform_4(%arg0: i32) -> (i32, i32) {
    %c0_i32 = arith.constant 0 : i32
    %c0_i32_0 = arith.constant 0 : i32
    %c0_i32_1 = arith.constant 0 : i32
    return %c0_i32, %c0_i32_0 : i32, i32
  }
  func.func @transform_5(%arg0: i32) -> (i32, i32, i32) {
    %c0_i32 = arith.constant 0 : i32
    %c0_i32_0 = arith.constant 0 : i32
    %c0_i32_1 = arith.constant 0 : i32
    return %arg0, %c0_i32, %c0_i32_0 : i32, i32, i32
  }
  func.func @transform_6(%arg0: i32) -> (i32, i32, i32) {
    %c0_i32 = arith.constant 0 : i32
    %c0_i32_0 = arith.constant 0 : i32
    %c0_i32_1 = arith.constant 0 : i32
    return %arg0, %c0_i32, %c0_i32_0 : i32, i32, i32
  }
}

</mosaic_0001>

<bundles_post_ra>
// kernel: _fused_forward.1
= control target key start
LH: loop header
LB: loop body
LE: loop exit
PB: predicated region body
PF: predicated region fallthrough
CT: control target
= control target key end

     0   :  { %s1592_s21 = smov 0   ;;  %s2575_s0 = inlined_call_operand.vmem [shape: f32[8,16,162], index: 0, kind: input, shape index: {}]   ;;  %s2576_s1 = inlined_call_operand.vmem [shape: f32[162,256], index: 1, kind: input, shape index: {}]   ;;  %s2577_s2 = inlined_call_operand.vmem [shape: f32[1,256], index: 2, kind: input, shape index: {}]   ;;  %s2578_s3 = inlined_call_operand.vmem [shape: f32[768,256], index: 3, kind: input, shape index: {}]   ;;  %s2579_s4 = inlined_call_operand.vmem [shape: f32[1,256], index: 4, kind: input, shape index: {}]   ;;  %s2580_s5 = inlined_call_operand.vmem [shape: f32[8,16,256], index: 5, kind: output, shape index: {0}]   ;;  %s2581_s6 = inlined_call_operand.vmem [shape: f32[8,16,256], index: 6, kind: output, shape index: {1}]  }
   0x1 LB: > { %s1510_s22 = sadd.s32 4294967295, %s1554_s21   ;;  %p1514_p0 = scmp.ge.s32.totalorder %s1554_s21, 1  ;;  %s1554_s21 = sphi %s1592_s21, %s17_s21  }
   0x2   : > { %p217_p1 = scmp.lt.s32.totalorder %s1554_s21, 3 }
   0x4   : > { %p218_p2 = pnand %p1514_p0, %p217_p1 }
   0x5   : > { %s1515_s29 = sshll.u32 (!%p218_p2), %s1510_s22, 2 }
   0x6   : > { %221 = sbr.rel (%p218_p2) target bundleno = 556 (0x22c), region = 40  ;;  %p256_p3 = scmp.lt.s32.totalorder (!%p218_p2), %s1515_s29, 7 }
   0xb   : > { %v323_v0 = vld [vmem:[%s2576_s1 + $0xf8] sm:$0xff]  ;;  %v322_v1 = vld [vmem:[%s2576_s1 + $0xf0] sm:$0xff]  ;;  %v321_v2 = vld [vmem:[%s2576_s1 + $0xe8] sm:$0xff]  ;;  %s2585_s29 = smov (!%p256_p3, %s1515_s29), 7  ;;  %vm346_vm0 = vcmask 277504   ;;  %vm371_vm1 = vcmask 1041408  }
   0xc   : > { %378 = vmatprep.subr.mxu0 %v323_v0  ;;  %v320_v3 = vld [vmem:[%s2576_s1 + $0xe0] sm:$0xff]  ;;  %v319_v4 = vld [vmem:[%s2576_s1 + $0xd8] sm:$0xff]  ;;  %v318_v5 = vld [vmem:[%s2576_s1 + $0xd0] sm:$0xff]  ;;  %s1633_s23 = sshll.u32 %s2585_s29, 5  ;;  %vm566_vm3 = vcmask 1040384   ;;  %vm695_vm4 = vcmask 1046528  }
   0xd   : > { %379 = vmatpush1.msra.mxu0 %v322_v1  ;;  %v317_v6 = vld [vmem:[%s2576_s1 + $0xc8] sm:$0xff]  ;;  %v316_v7 = vld [vmem:[%s2576_s1 + $0xc0] sm:$0xff]  ;;  %v315_v8 = vld [vmem:[%s2576_s1 + $0xb8] sm:$0xff]  ;;  %s1648_s29 = scalar_lea.vmem %s2575_s0, %s1633_s23  ;;  %s2187_s30 = scalar_lea.vmem %s2580_s5, %s1633_s23  ;;  %vm784_vm5 = vcmask 1045504  }
   0xe   : > { %380 = vmatprep.subr.mxu0 %v321_v2  ;;  %v314_v9 = vld [vmem:[%s2576_s1 + $0xb0] sm:$0xff]  ;;  %v313_v10 = vld [vmem:[%s2576_s1 + $0xa8] sm:$0xff]  ;;  %v312_v11 = vld [vmem:[%s2576_s1 + $0xa0] sm:$0xff] }
   0xf   : > { %381 = vmatpush1.msra.mxu0 %v320_v3  ;;  %v311_v12 = vld [vmem:[%s2576_s1 + $0x98] sm:$0xff]  ;;  %v310_v13 = vld [vmem:[%s2576_s1 + $0x90] sm:$0xff]  ;;  %v309_v14 = vld [vmem:[%s2576_s1 + $0x88] sm:$0xff] }
  0x10   : > { %382 = vmatprep.subr.mxu0 %v319_v4  ;;  %v308_v15 = vld [vmem:[%s2576_s1 + $0x80] sm:$0xff]  ;;  %v307_v16 = vld [vmem:[%s2576_s1 + $0x78] sm:$0xff]  ;;  %v277_v17 = vld [vmem:[%s1648_s29 + $0x8] sm:$0xff] }
  0x11   : > { %383 = vmatpush1.msra.mxu0 %v318_v5  ;;  %v306_v18 = vld [vmem:[%s2576_s1 + $0x70] sm:$0xff]  ;;  %1526 = vmatprep.mubr.msk.f32.mxu0 %vm346_vm0, %v277_v17  ;;  %v305_v19 = vld [vmem:[%s2576_s1 + $0x68] sm:$0xff]  ;;  %v304_v20 = vld [vmem:[%s2576_s1 + $0x60] sm:$0xff] }
  0x12   : > { %384 = vmatprep.subr.mxu0 %v317_v6  ;;  %v303_v21 = vld [vmem:[%s2576_s1 + $0x58] sm:$0xff]  ;;  %v302_v22 = vld [vmem:[%s2576_s1 + $0x50] sm:$0xff]  ;;  %v301_v25 = vld [vmem:[%s2576_s1 + $0x48] sm:$0xff] }
  0x13   : > { %385 = vmatpush1.msra.mxu0 %v316_v7  ;;  %v872_v23 = vld [vmem:[%s2578_s3 + $0xf8] sm:$0xff]  ;;  %v871_v24 = vld [vmem:[%s2578_s3 + $0xf0] sm:$0xff]  ;;  %v870_v26 = vld [vmem:[%s2578_s3 + $0xe8] sm:$0xff] }
  0x14   : > { %386 = vmatprep.subr.mxu0 %v315_v8  ;;  %1045 = vmatprep.subr.mxu1 %v872_v23  ;;  %v869_v27 = vld [vmem:[%s2578_s3 + $0xe0] sm:$0xff]  ;;  %v868_v29 = vld [vmem:[%s2578_s3 + $0xd8] sm:$0xff]  ;;  %v867_v31 = vld [vmem:[%s2578_s3 + $0xd0] sm:$0xff] }
  0x15   : > { %387 = vmatpush1.msra.mxu0 %v314_v9  ;;  %v300_v28 = vld [vmem:[%s2576_s1 + $0x40] sm:$0xff]  ;;  %1046 = vmatpush1.msra.mxu1 %v871_v24  ;;  %v299_v30 = vld [vmem:[%s2576_s1 + $0x38] sm:$0xff]  ;;  %v298_v32 = vld [vmem:[%s2576_s1 + $0x30] sm:$0xff] }
  0x16   : > { %388 = vmatprep.subr.mxu0 %v313_v10  ;;  %1047 = vmatprep.subr.mxu1 %v870_v26  ;;  %v866_v33 = vld [vmem:[%s2578_s3 + $0xc8] sm:$0xff]  ;;  %v865_v35 = vld [vmem:[%s2578_s3 + $0xc0] sm:$0xff]  ;;  %v864_v37 = vld [vmem:[%s2578_s3 + $0xb8] sm:$0xff] }
  0x17   : > { %389 = vmatpush1.msra.mxu0 %v312_v11  ;;  %1048 = vmatpush1.msra.mxu1 %v869_v27  ;;  %v297_v34 = vld [vmem:[%s2576_s1 + $0x28] sm:$0xff]  ;;  %v296_v36 = vld [vmem:[%s2576_s1 + $0x20] sm:$0xff]  ;;  %v295_v38 = vld [vmem:[%s2576_s1 + $0x18] sm:$0xff] }
  0x18   : > { %390 = vmatprep.subr.mxu0 %v311_v12  ;;  %1049 = vmatprep.subr.mxu1 %v868_v29  ;;  %v863_v39 = vld [vmem:[%s2578_s3 + $0xb0] sm:$0xff]  ;;  %v862_v41 = vld [vmem:[%s2578_s3 + $0xa8] sm:$0xff]  ;;  %v861_v43 = vld [vmem:[%s2578_s3 + $0xa0] sm:$0xff] }
  0x19   : > { %391 = vmatpush1.msra.mxu0 %v310_v13  ;;  %1050 = vmatpush1.msra.mxu1 %v867_v31  ;;  %v294_v40 = vld [vmem:[%s2576_s1 + $0x10] sm:$0xff]  ;;  %v293_v42 = vld [vmem:[%s2576_s1 + $0x8] sm:$0xff]  ;;  %v292_v44 = vld [vmem:[%s2576_s1] sm:$0xff] }
  0x1a   : > { %392 = vmatprep.subr.mxu0 %v309_v14  ;;  %1051 = vmatprep.subr.mxu1 %v866_v33  ;;  %v860_v45 = vld [vmem:[%s2578_s3 + $0x98] sm:$0xff]  ;;  %v333_v46 = vld [vmem:[%s2576_s1 + $0x148] sm:$0x3]  ;;  %v859_v47 = vld [vmem:[%s2578_s3 + $0x90] sm:$0xff] }
  0x1b   : > { %393 = vmatpush1.msra.mxu0 %v308_v15  ;;  %1052 = vmatpush1.msra.mxu1 %v865_v35  ;;  %v332_v48 = vld [vmem:[%s2576_s1 + $0x140] sm:$0x3]  ;;  %v858_v49 = vld [vmem:[%s2578_s3 + $0x88] sm:$0xff]  ;;  %v331_v50 = vld [vmem:[%s2576_s1 + $0x138] sm:$0xff] }
  0x1c   : > { %394 = vmatprep.subr.mxu0 %v307_v16  ;;  %1053 = vmatprep.subr.mxu1 %v864_v37  ;;  %v857_v51 = vld [vmem:[%s2578_s3 + $0x80] sm:$0xff]  ;;  %v330_v52 = vld [vmem:[%s2576_s1 + $0x130] sm:$0xff]  ;;  %v856_v53 = vld [vmem:[%s2578_s3 + $0x78] sm:$0xff] }
  0x1d   : > { %395 = vmatpush1.msra.mxu0 %v306_v18  ;;  %1054 = vmatpush1.msra.mxu1 %v863_v39  ;;  %v329_v54 = vld [vmem:[%s2576_s1 + $0x128] sm:$0xff]  ;;  %v855_v55 = vld [vmem:[%s2578_s3 + $0x70] sm:$0xff]  ;;  %v328_v56 = vld [vmem:[%s2576_s1 + $0x120] sm:$0xff] }
  0x1e   : > { %396 = vmatprep.subr.mxu0 %v305_v19  ;;  %1055 = vmatprep.subr.mxu1 %v862_v41  ;;  %v854_v57 = vld [vmem:[%s2578_s3 + $0x68] sm:$0xff]  ;;  %v327_v58 = vld [vmem:[%s2576_s1 + $0x118] sm:$0xff]  ;;  %v853_v59 = vld [vmem:[%s2578_s3 + $0x60] sm:$0xff] }
  0x1f   : > { %397 = vmatpush1.msra.mxu0 %v304_v20  ;;  %1056 = vmatpush1.msra.mxu1 %v861_v43  ;;  %v326_v60 = vld [vmem:[%s2576_s1 + $0x110] sm:$0xff]  ;;  %v852_v61 = vld [vmem:[%s2578_s3 + $0x58] sm:$0xff]  ;;  %v325_v62 = vld [vmem:[%s2576_s1 + $0x108] sm:$0xff] }
  0x20   : > { %398 = vmatprep.subr.mxu0 %v303_v21  ;;  %1057 = vmatprep.subr.mxu1 %v860_v45  ;;  %v851_v63 = vld [vmem:[%s2578_s3 + $0x50] sm:$0xff]  ;;  %v324_v0 = vld [vmem:[%s2576_s1 + $0x100] sm:$0xff]  ;;  %v850_v1 = vld [vmem:[%s2578_s3 + $0x48] sm:$0xff] }
  0x21   : > { %399 = vmatpush1.msra.mxu0 %v302_v22  ;;  %1058 = vmatpush1.msra.mxu1 %v859_v47  ;;  %v276_v2 = vld [vmem:[%s1648_s29] sm:$0xff]  ;;  %v936_v3 = vld [vmem:[%s2578_s3 + $0x2f8] sm:$0xff]  ;;  %v935_v5 = vld [vmem:[%s2578_s3 + $0x2f0] sm:$0xff] }
  0x22   : > { %400 = vmatprep.subr.mxu0 %v301_v25  ;;  %1059 = vmatprep.subr.mxu1 %v858_v49  ;;  %v279_v4 = vld [vmem:[%s1648_s29 + $0x18] sm:$0xff]  ;;  %v934_v6 = vld [vmem:[%s2578_s3 + $0x2e8] sm:$0xff]  ;;  %v849_v7 = vld [vmem:[%s2578_s3 + $0x40] sm:$0xff] }
  0x23   : > { %401 = vmatpush1.msra.mxu0 %v300_v28  ;;  %1060 = vmatpush1.msra.mxu1 %v857_v51  ;;  %v933_v8 = vld [vmem:[%s2578_s3 + $0x2e0] sm:$0xff]  ;;  %v848_v9 = vld [vmem:[%s2578_s3 + $0x38] sm:$0xff]  ;;  %v278_v10 = vld [vmem:[%s1648_s29 + $0x10] sm:$0xff] }
  0x24   : > { %402 = vmatprep.subr.mxu0 %v299_v30  ;;  %1061 = vmatprep.subr.mxu1 %v856_v53  ;;  %v932_v11 = vld [vmem:[%s2578_s3 + $0x2d8] sm:$0xff]  ;;  %v281_v12 = vld [vmem:[%s1648_s29 + $0x28] sm:$0xff]  ;;  %v931_v13 = vld [vmem:[%s2578_s3 + $0x2d0] sm:$0xff] }
  0x25   : > { %403 = vmatpush1.msra.mxu0 %v298_v32  ;;  %1062 = vmatpush1.msra.mxu1 %v855_v55  ;;  %v930_v14 = vld [vmem:[%s2578_s3 + $0x2c8] sm:$0xff]  ;;  %v847_v15 = vld [vmem:[%s2578_s3 + $0x30] sm:$0xff]  ;;  %v929_v16 = vld [vmem:[%s2578_s3 + $0x2c0] sm:$0xff] }
  0x26   : > { %404 = vmatprep.subr.mxu0 %v297_v34  ;;  %1063 = vmatprep.subr.mxu1 %v854_v57  ;;  %v846_v17 = vld [vmem:[%s2578_s3 + $0x28] sm:$0xff]  ;;  %v280_v18 = vld [vmem:[%s1648_s29 + $0x20] sm:$0xff]  ;;  %v928_v19 = vld [vmem:[%s2578_s3 + $0x2b8] sm:$0xff] }
  0x27   : > { %405 = vmatpush1.msra.mxu0 %v296_v36  ;;  %1064 = vmatpush1.msra.mxu1 %v853_v59  ;;  %v283_v20 = vld [vmem:[%s1648_s29 + $0x38] sm:$0xff]  ;;  %v927_v21 = vld [vmem:[%s2578_s3 + $0x2b0] sm:$0xff]  ;;  %v926_v22 = vld [vmem:[%s2578_s3 + $0x2a8] sm:$0xff] }
  0x28   : > { %406 = vmatprep.subr.mxu0 %v295_v38  ;;  %1065 = vmatprep.subr.mxu1 %v852_v61  ;;  %v845_v23 = vld [vmem:[%s2578_s3 + $0x20] sm:$0xff]  ;;  %v844_v25 = vld [vmem:[%s2578_s3 + $0x18] sm:$0xff]  ;;  %v282_v26 = vld [vmem:[%s1648_s29 + $0x30] sm:$0xff] }
  0x29   : > { %407 = vmatpush1.msra.mxu0 %v294_v40  ;;  %1066 = vmatpush1.msra.mxu1 %v851_v63  ;;  %v925_v24 = vld [vmem:[%s2578_s3 + $0x2a0] sm:$0xff]  ;;  %v924_v27 = vld [vmem:[%s2578_s3 + $0x298] sm:$0xff]  ;;  %v285_v28 = vld [vmem:[%s1648_s29 + $0x48] sm:$0xff] }
  0x2a   : > { %408 = vmatprep.subr.mxu0 %v293_v42  ;;  %1067 = vmatprep.subr.mxu1 %v850_v1  ;;  %v923_v29 = vld [vmem:[%s2578_s3 + $0x290] sm:$0xff]  ;;  %v922_v30 = vld [vmem:[%s2578_s3 + $0x288] sm:$0xff]  ;;  %v921_v32 = vld [vmem:[%s2578_s3 + $0x280] sm:$0xff] }
  0x2b   : > { %409 = vmatpush1.msra.mxu0 %v292_v44  ;;  %1068 = vmatpush1.msra.mxu1 %v849_v7  ;;  %v843_v31 = vld [vmem:[%s2578_s3 + $0x10] sm:$0xff]  ;;  %v842_v33 = vld [vmem:[%s2578_s3 + $0x8] sm:$0xff]  ;;  %v284_v34 = vld [vmem:[%s1648_s29 + $0x40] sm:$0xff] }
  0x2c   : > { %1524 = vmatprep.subr.msk.mxu0 %vm371_vm1, %v333_v46  ;;  %1069 = vmatprep.subr.mxu1 %v848_v9  ;;  %v920_v35 = vld [vmem:[%s2578_s3 + $0x278] sm:$0xff]  ;;  %v919_v37 = vld [vmem:[%s2578_s3 + $0x270] sm:$0xff]  ;;  %v918_v38 = vld [vmem:[%s2578_s3 + $0x268] sm:$0xff] }
  0x2d   : > { %1525 = vmatpush2.msk.msra.mxu0 %vm371_vm1, %v332_v48  ;;  %1070 = vmatpush1.msra.mxu1 %v847_v15  ;;  %v287_v36 = vld [vmem:[%s1648_s29 + $0x58] sm:$0xff]  ;;  %v841_v39 = vld [vmem:[%s2578_s3] sm:$0xff]  ;;  %v286_v42 = vld [vmem:[%s1648_s29 + $0x50] sm:$0xff] }
  0x2e   : > { %434 = vmatprep.subr.mxu0 %v331_v50  ;;  %1071 = vmatprep.subr.mxu1 %v846_v17  ;;  %v917_v40 = vld [vmem:[%s2578_s3 + $0x260] sm:$0xff]  ;;  %v904_v41 = vld [vmem:[%s2578_s3 + $0x1f8] sm:$0xff]  ;;  %v289_v44 = vld [vmem:[%s1648_s29 + $0x68] sm:$0xff] }
  0x2f   : > { %435 = vmatpush2.msra.mxu0 %v330_v52  ;;  %1072 = vmatpush1.msra.mxu1 %v845_v23  ;;  %v916_v43 = vld [vmem:[%s2578_s3 + $0x258] sm:$0xff]  ;;  %v915_v45 = vld [vmem:[%s2578_s3 + $0x250] sm:$0xff]  ;;  %v914_v46 = vld [vmem:[%s2578_s3 + $0x248] sm:$0xff] }
  0x30   : > { %436 = vmatprep.subr.mxu0 %v329_v54  ;;  %1073 = vmatprep.subr.mxu1 %v844_v25  ;;  %v903_v47 = vld [vmem:[%s2578_s3 + $0x1f0] sm:$0xff]  ;;  %v913_v48 = vld [vmem:[%s2578_s3 + $0x240] sm:$0xff]  ;;  %v902_v49 = vld [vmem:[%s2578_s3 + $0x1e8] sm:$0xff] }
  0x31   : > { %437 = vmatpush2.msra.mxu0 %v328_v56  ;;  %1074 = vmatpush1.msra.mxu1 %v843_v31  ;;  %v288_v50 = vld [vmem:[%s1648_s29 + $0x60] sm:$0xff]  ;;  %v912_v51 = vld [vmem:[%s2578_s3 + $0x238] sm:$0xff]  ;;  %v911_v53 = vld [vmem:[%s2578_s3 + $0x230] sm:$0xff] }
  0x32   : > { %438 = vmatprep.subr.mxu0 %v327_v58  ;;  %1075 = vmatprep.subr.mxu1 %v842_v33  ;;  %v291_v52 = vld [vmem:[%s1648_s29 + $0x78] sm:$0xff]  ;;  %v901_v54 = vld [vmem:[%s2578_s3 + $0x1e0] sm:$0xff]  ;;  %v910_v55 = vld [vmem:[%s2578_s3 + $0x228] sm:$0xff] }
  0x33   : > { %439 = vmatpush2.msra.mxu0 %v326_v60  ;;  %1076 = vmatpush1.msra.mxu1 %v841_v39  ;;  %v900_v56 = vld [vmem:[%s2578_s3 + $0x1d8] sm:$0xff]  ;;  %v909_v57 = vld [vmem:[%s2578_s3 + $0x220] sm:$0xff]  ;;  %v290_v58 = vld [vmem:[%s1648_s29 + $0x70] sm:$0xff] }
  0x34   : > { %440 = vmatprep.subr.mxu0 %v325_v62  ;;  %1077 = vmatprep.subr.mxu1 %v904_v41  ;;  %v899_v59 = vld [vmem:[%s2578_s3 + $0x1d0] sm:$0xff]  ;;  %v908_v60 = vld [vmem:[%s2578_s3 + $0x218] sm:$0xff]  ;;  %v898_v61 = vld [vmem:[%s2578_s3 + $0x1c8] sm:$0xff] }
  0x35   : > { %441 = vmatpush2.msra.mxu0 %v324_v0  ;;  %1078 = vmatpush2.msra.mxu1 %v903_v47  ;;  %v907_v62 = vld [vmem:[%s2578_s3 + $0x210] sm:$0xff]  ;;  %v897_v63 = vld [vmem:[%s2578_s3 + $0x1c0] sm:$0xff]  ;;  %v906_v0 = vld [vmem:[%s2578_s3 + $0x208] sm:$0xff] }
  0x36   : > { %443 = vmatmul.mubr.f32.vlgmr.msra.gmra.mxu0 %v276_v2  ;;  %1158 = vmatprep.subr.mxu0 %v936_v3  ;;  %v896_v1 = vld [vmem:[%s2578_s3 + $0x1b8] sm:$0xff]  ;;  %v905_v2 = vld [vmem:[%s2578_s3 + $0x200] sm:$0xff]  ;;  %v895_v3 = vld [vmem:[%s2578_s3 + $0x1b0] sm:$0xff] }
  0x37   : > { %1527 = vmatprep.mubr.msk.f32.mxu0 %vm346_vm0, %v279_v4  ;;  %1159 = vmatpush1.msra.mxu0 %v935_v5  ;;  %v968_v4 = vld [vmem:[%s2578_s3 + $0x3f8] sm:$0xff]  ;;  %v894_v5 = vld [vmem:[%s2578_s3 + $0x1a8] sm:$0xff]  ;;  %v893_v7 = vld [vmem:[%s2578_s3 + $0x1a0] sm:$0xff] }
  0x38   : > { %1160 = vmatprep.subr.mxu0 %v934_v6  ;;  %1079 = vmatprep.subr.mxu1 %v902_v49  ;;  %v967_v6 = vld [vmem:[%s2578_s3 + $0x3f0] sm:$0xff]  ;;  %v892_v9 = vld [vmem:[%s2578_s3 + $0x198] sm:$0xff]  ;;  %v962_v15 = vld [vmem:[%s2578_s3 + $0x3c8] sm:$0xff] }
  0x39   : > { %1161 = vmatpush1.msra.mxu0 %v933_v8  ;;  %1080 = vmatpush2.msra.mxu1 %v901_v54  ;;  %v966_v8 = vld [vmem:[%s2578_s3 + $0x3e8] sm:$0xff]  ;;  %v960_v17 = vld [vmem:[%s2578_s3 + $0x3b8] sm:$0xff]  ;;  %v955_v25 = vld [vmem:[%s2578_s3 + $0x390] sm:$0xff] }
  0x3a   : > { %449 = vmatmul.mubr.f32.gmra.mxu0 %v278_v10  ;;  %1162 = vmatprep.subr.mxu0 %v932_v11  ;;  %v965_v10 = vld [vmem:[%s2578_s3 + $0x3e0] sm:$0xff]  ;;  %v891_v11 = vld [vmem:[%s2578_s3 + $0x190] sm:$0xff]  ;;  %v956_v23 = vld [vmem:[%s2578_s3 + $0x398] sm:$0xff] }
  0x3b   : > { %1528 = vmatprep.mubr.msk.f32.mxu0 %vm346_vm0, %v281_v12  ;;  %1163 = vmatpush1.msra.mxu0 %v931_v13  ;;  %v964_v12 = vld [vmem:[%s2578_s3 + $0x3d8] sm:$0xff]  ;;  %v890_v13 = vld [vmem:[%s2578_s3 + $0x188] sm:$0xff]  ;;  %v949_v39 = vld [vmem:[%s2578_s3 + $0x360] sm:$0xff] }
  0x3c   : > { %1164 = vmatprep.subr.mxu0 %v930_v14  ;;  %1081 = vmatprep.subr.mxu1 %v900_v56  ;;  %v963_v14 = vld [vmem:[%s2578_s3 + $0x3d0] sm:$0xff]  ;;  %v884_v31 = vld [vmem:[%s2578_s3 + $0x158] sm:$0xff]  ;;  %v877_v47 = vld [vmem:[%s2578_s3 + $0x120] sm:$0xff] }
  0x3d   : > { %1165 = vmatpush1.msra.mxu0 %v929_v16  ;;  %1082 = vmatpush2.msra.mxu1 %v899_v59  ;;  %v961_v16 = vld [vmem:[%s2578_s3 + $0x3c0] sm:$0xff]  ;;  %v880_v41 = vld [vmem:[%s2578_s3 + $0x138] sm:$0xff]  ;;  %v939_v59 = vld [vmem:[%s2578_s3 + $0x310] sm:$0xff] }
  0x3e   : > { %455 = vmatmul.mubr.f32.gmra.mxu0 %v280_v18  ;;  %1166 = vmatprep.subr.mxu0 %v928_v19  ;;  %v959_v18 = vld [vmem:[%s2578_s3 + $0x3b0] sm:$0xff]  ;;  %v958_v19 = vld [vmem:[%s2578_s3 + $0x3a8] sm:$0xff]  ;;  %v876_v49 = vld [vmem:[%s2578_s3 + $0x118] sm:$0xff] }
  0x3f   : > { %1529 = vmatprep.mubr.msk.f32.mxu0 %vm346_vm0, %v283_v20  ;;  %1167 = vmatpush1.msra.mxu0 %v927_v21  ;;  %v889_v20 = vld [vmem:[%s2578_s3 + $0x180] sm:$0xff]  ;;  %v1000_v56 = vld [vmem:[%s2578_s3 + $0x4f8] sm:$0xff] }
  0x40   : > { %1168 = vmatprep.subr.mxu0 %v926_v22  ;;  %1083 = vmatprep.subr.mxu1 %v898_v61  ;;  %v957_v21 = vld [vmem:[%s2578_s3 + $0x3a0] sm:$0xff]  ;;  %v888_v22 = vld [vmem:[%s2578_s3 + $0x178] sm:$0xff] }
  0x41   : > { %1169 = vmatpush1.msra.mxu0 %v925_v24  ;;  %1084 = vmatpush2.msra.mxu1 %v897_v63  ;;  %v887_v24 = vld [vmem:[%s2578_s3 + $0x170] sm:$0xff]  ;;  %v873_v54 = vld [vmem:[%s2578_s3 + $0x100] sm:$0xff] }
  0x42   : > { %461 = vmatmul.mubr.f32.gmra.mxu0 %v282_v26  ;;  %1170 = vmatprep.subr.mxu0 %v924_v27  ;;  %v886_v26 = vld [vmem:[%s2578_s3 + $0x168] sm:$0xff]  ;;  %v937_v61 = vld [vmem:[%s2578_s3 + $0x300] sm:$0xff] }
  0x43   : > { %1530 = vmatprep.mubr.msk.f32.mxu0 %vm346_vm0, %v285_v28  ;;  %1171 = vmatpush1.msra.mxu0 %v923_v29  ;;  %v954_v27 = vld [vmem:[%s2578_s3 + $0x388] sm:$0xff]  ;;  %v336_v28 = vlaneseq  ;;  %v885_v29 = vld [vmem:[%s2578_s3 + $0x160] sm:$0xff] }
  0x44   : > { %1172 = vmatprep.subr.mxu0 %v922_v30  ;;  %1085 = vmatprep.subr.mxu1 %v896_v1  ;;  %v953_v30 = vld [vmem:[%s2578_s3 + $0x380] sm:$0xff] }
  0x45   : > { %1173 = vmatpush1.msra.mxu0 %v921_v32  ;;  %1086 = vmatpush2.msra.mxu1 %v895_v3  ;;  %v952_v32 = vld [vmem:[%s2578_s3 + $0x378] sm:$0xff]  ;;  %vm2065_vm2 = vcmp.lt.s32.totalorder %v336_v28, 256 }
  0x46   : > { %467 = vmatmul.mubr.f32.gmra.mxu0 %v284_v34  ;;  %1174 = vmatprep.subr.mxu0 %v920_v35  ;;  %v883_v34 = vld [vmem:[%s2578_s3 + $0x150] sm:$0xff] }
  0x47   : > { %1531 = vmatprep.mubr.msk.f32.mxu0 %vm346_vm0, %v287_v36  ;;  %1175 = vmatpush1.msra.mxu0 %v919_v37  ;;  %v951_v35 = vld [vmem:[%s2578_s3 + $0x370] sm:$0xff]  ;;  %v882_v36 = vld [vmem:[%s2578_s3 + $0x148] sm:$0xff] }
  0x48   : > { %1176 = vmatprep.subr.mxu0 %v918_v38  ;;  %1087 = vmatprep.subr.mxu1 %v894_v5  ;;  %v950_v37 = vld [vmem:[%s2578_s3 + $0x368] sm:$0xff]  ;;  %v881_v38 = vld [vmem:[%s2578_s3 + $0x140] sm:$0xff] }
  0x49   : > { %1177 = vmatpush1.msra.mxu0 %v917_v40  ;;  %1088 = vmatpush2.msra.mxu1 %v893_v7  ;;  %v1556_v40 = vmov 0.0  }
  0x4a   : > { %473 = vmatmul.mubr.f32.gmra.mxu0 %v286_v42  ;;  %1178 = vmatprep.subr.mxu0 %v916_v43  ;;  %527 = vst.msk [vmem:[#allocation2] ss:$8 sm:$0x3] %vm2065_vm2, %v1556_v40  ;;  %530 = vst.msk [vmem:[#allocation2 + $0x30] ss:$8 sm:$0x3] %vm2065_vm2, %v1556_v40 }
  0x4b   : > { %1532 = vmatprep.mubr.msk.f32.mxu0 %vm346_vm0, %v289_v44  ;;  %1179 = vmatpush1.msra.mxu0 %v915_v45  ;;  %533 = vst.msk [vmem:[#allocation2 + $0x60] ss:$8 sm:$0x3] %vm2065_vm2, %v1556_v40  ;;  %536 = vst.msk [vmem:[#allocation2 + $0x90] ss:$8 sm:$0x3] %vm2065_vm2, %v1556_v40 }
  0x4c   : > { %1180 = vmatprep.subr.mxu0 %v914_v46  ;;  %1089 = vmatprep.subr.mxu1 %v892_v9  ;;  %539 = vst.msk [vmem:[#allocation2 + $0x21] ss:$8 sm:$0x3] %vm2065_vm2, %v1556_v40  ;;  %542 = vst.msk [vmem:[#allocation2 + $0x51] ss:$8 sm:$0x3] %vm2065_vm2, %v1556_v40 }
  0x4d   : > { %1181 = vmatpush1.msra.mxu0 %v913_v48  ;;  %1090 = vmatpush2.msra.mxu1 %v891_v11  ;;  %545 = vst.msk [vmem:[#allocation2 + $0x81] ss:$8 sm:$0x3] %vm2065_vm2, %v1556_v40  ;;  %548 = vst.msk [vmem:[#allocation2 + $0xb1] ss:$8 sm:$0x3] %vm2065_vm2, %v1556_v40 }
  0x4e   : > { %479 = vmatmul.mubr.f32.gmra.mxu0 %v288_v50  ;;  %1182 = vmatprep.subr.mxu0 %v912_v51  ;;  %v948_v42 = vld [vmem:[%s2578_s3 + $0x358] sm:$0xff]  ;;  %v879_v43 = vld [vmem:[%s2578_s3 + $0x130] sm:$0xff]  ;;  %v878_v45 = vld [vmem:[%s2578_s3 + $0x128] sm:$0xff] }
  0x4f   : > { %1533 = vmatprep.mubr.msk.f32.mxu0 %vm346_vm0, %v291_v52  ;;  %1183 = vmatpush1.msra.mxu0 %v911_v53  ;;  %v947_v44 = vld [vmem:[%s2578_s3 + $0x350] sm:$0xff]  ;;  %v946_v46 = vld [vmem:[%s2578_s3 + $0x348] sm:$0xff]  ;;  %v945_v48 = vld [vmem:[%s2578_s3 + $0x340] sm:$0xff] }
  0x50   : > { %1184 = vmatprep.subr.mxu0 %v910_v55  ;;  %1091 = vmatprep.subr.mxu1 %v890_v13  ;;  %v944_v50 = vld [vmem:[%s2578_s3 + $0x338] sm:$0xff]  ;;  %v875_v51 = vld [vmem:[%s2578_s3 + $0x110] sm:$0xff]  ;;  %v874_v52 = vld [vmem:[%s2578_s3 + $0x108] sm:$0xff] }
  0x51   : > { %1185 = vmatpush1.msra.mxu0 %v909_v57  ;;  %1092 = vmatpush2.msra.mxu1 %v889_v20  ;;  %v943_v53 = vld [vmem:[%s2578_s3 + $0x330] sm:$0xff]  ;;  %v942_v55 = vld [vmem:[%s2578_s3 + $0x328] sm:$0xff]  ;;  %v941_v57 = vld [vmem:[%s2578_s3 + $0x320] sm:$0xff] }
  0x52   : > { %485 = vmatmul.mubr.f32.gmra.mxu0 %v290_v58  ;;  %1186 = vmatprep.subr.mxu0 %v908_v60  ;;  %v940_v58 = vld [vmem:[%s2578_s3 + $0x318] sm:$0xff]  ;;  %v938_v60 = vld [vmem:[%s2578_s3 + $0x308] sm:$0xff] }
  0x53   : > { %1187 = vmatpush1.msra.mxu0 %v907_v62  ;;  %1093 = vmatprep.subr.mxu1 %v888_v22  ;;  %v2167_v62 = vshrl.u32 %v336_v28, 7 }
  0x54   : > { %1188 = vmatprep.subr.mxu0 %v906_v0  ;;  %1094 = vmatpush2.msra.mxu1 %v887_v24  ;;  %v334_v0 = vld [vmem:[%s2577_s2] sm:$0x3] }
  0x55   : > { %1189 = vmatpush1.msra.mxu0 %v905_v2  ;;  %1095 = vmatprep.subr.mxu1 %v886_v26  ;;  %v338_v63 = vsub.s32 0, %v2167_v62  ;;  %v342_v1 = vsub.s32 1, %v2167_v62 }
  0x56   : > { %1190 = vmatprep.subr.mxu0 %v968_v4  ;;  %1096 = vmatpush2.msra.mxu1 %v885_v29 }
  0x57   : > { %1191 = vmatpush2.msra.mxu0 %v967_v6  ;;  %1097 = vmatprep.subr.mxu1 %v884_v31  ;;  %v2176_v2 = vrot.slane %v334_v0, %v338_v63  ;;  %v2180_v3 = vrot.slane %v334_v0, %v342_v1 }
  0x58   : > { %1192 = vmatprep.subr.mxu0 %v966_v8  ;;  %1098 = vmatpush2.msra.mxu1 %v883_v34 }
  0x59   : > { %1193 = vmatpush2.msra.mxu0 %v965_v10  ;;  %1099 = vmatprep.subr.mxu1 %v882_v36 }
  0x5a   : > { %1194 = vmatprep.subr.mxu0 %v964_v12  ;;  %1100 = vmatpush2.msra.mxu1 %v881_v38  ;;  %v999_v38 = vld [vmem:[%s2578_s3 + $0x4f0] sm:$0xff] }
  0x5b   : > { %1195 = vmatpush2.msra.mxu0 %v963_v14  ;;  %1101 = vmatprep.subr.mxu1 %v880_v41 }
  0x5c   : > { %1196 = vmatprep.subr.mxu0 %v962_v15  ;;  %1102 = vmatpush2.msra.mxu1 %v879_v43 }
  0x5d   : > { %1197 = vmatpush2.msra.mxu0 %v961_v16  ;;  %1103 = vmatprep.subr.mxu1 %v878_v45 }
  0x5e   : > { %1198 = vmatprep.subr.mxu0 %v960_v17  ;;  %1104 = vmatpush2.msra.mxu1 %v877_v47  ;;  %v997_v47 = vld [vmem:[%s2578_s3 + $0x4e0] sm:$0xff] }
  0x5f   : > { %1199 = vmatpush2.msra.mxu0 %v959_v18  ;;  %1105 = vmatprep.subr.mxu1 %v876_v49 }
  0x60   : > { %1200 = vmatprep.subr.mxu0 %v958_v19  ;;  %1106 = vmatpush2.msra.mxu1 %v875_v51 }
  0x61   : > { %1201 = vmatpush2.msra.mxu0 %v957_v21  ;;  %1107 = vmatprep.subr.mxu1 %v874_v52 }
  0x62   : > { %1202 = vmatprep.subr.mxu0 %v956_v23  ;;  %1108 = vmatpush2.msra.mxu1 %v873_v54  ;;  %v996_v54 = vld [vmem:[%s2578_s3 + $0x4d8] sm:$0xff] }
  0x63   : > { %1203 = vmatpush2.msra.mxu0 %v955_v25  ;;  %1271 = vmatprep.subr.mxu1 %v1000_v56  ;;  %v995_v56 = vld [vmem:[%s2578_s3 + $0x4d0] sm:$0xff] }
  0x64   : > { %1204 = vmatprep.subr.mxu0 %v954_v27 }
  0x65   : > { %1205 = vmatpush2.msra.mxu0 %v953_v30 }
  0x66   : > { %1206 = vmatprep.subr.mxu0 %v952_v32 }
  0x67   : > { %1207 = vmatpush2.msra.mxu0 %v951_v35 }
  0x68   : > { %1208 = vmatprep.subr.mxu0 %v950_v37 }
  0x69   : > { %1209 = vmatpush2.msra.mxu0 %v949_v39 }
  0x6a   : > { %1210 = vmatprep.subr.mxu0 %v948_v42 }
  0x6b   : > { %1211 = vmatpush2.msra.mxu0 %v947_v44  ;;  %v998_v44 = vld [vmem:[%s2578_s3 + $0x4e8] sm:$0xff] }
  0x6c   : > { %1212 = vmatprep.subr.mxu0 %v946_v46 }
  0x6d   : > { %1213 = vmatpush2.msra.mxu0 %v945_v48 }
  0x6e   : > { %1214 = vmatprep.subr.mxu0 %v944_v50 }
  0x6f   : > { %1215 = vmatpush2.msra.mxu0 %v943_v53 }
  0x70   : > { %1216 = vmatprep.subr.mxu0 %v942_v55 }
  0x71   : > { %1217 = vmatpush2.msra.mxu0 %v941_v57 }
  0x72   : > { %1218 = vmatprep.subr.mxu0 %v940_v58 }
  0x73   : > { %1219 = vmatpush2.msra.mxu0 %v939_v59 }
  0x74   : > { %1220 = vmatprep.subr.mxu0 %v938_v60 }
  0x75   : > { %1221 = vmatpush2.msra.mxu0 %v937_v61 }
  0xf6   : > { %v444_v4 = vpop.f32.mrf.mxu0 }
  0xf7   : > { %v445_v5 = vadd.f32 %v444_v4, %v2176_v2 }
  0xf8   : > { %v446_v6 = vpop.f32.mrf.mxu0 }
  0xf9   : > { %v491_v7 = vmax.f32 %v445_v5, 0.0  ;;  %v447_v8 = vadd.f32 %v446_v6, %v2180_v3  ;;  %v994_v5 = vld [vmem:[%s2578_s3 + $0x4c8] sm:$0xff] }
  0xfa   : > { %v450_v9 = vpop.f32.mrf.mxu0 }
  0xfb   : > { %507 = vst [vmem:[%s2187_s30] sm:$0xff] %v491_v7  ;;  %v567_v10 = vrot.slane %v491_v7, 7  ;;  %v492_v11 = vmax.f32 %v447_v8, 0.0  ;;  %v451_v12 = vadd.f32 %v450_v9, %v2176_v2  ;;  %v993_v8 = vld [vmem:[%s2578_s3 + $0x4c0] sm:$0xff] }
  0xfc   : > { %v452_v13 = vpop.f32.mrf.mxu0 }
  0xfd   : > { %615 = vst [vmem:[#allocation2] sm:$0xfe] %v567_v10  ;;  %508 = vst [vmem:[%s2187_s30 + $0x8] sm:$0xff] %v492_v11  ;;  %v568_v14 = vrot.slane %v492_v11, 7  ;;  %v493_v15 = vmax.f32 %v451_v12, 0.0  ;;  %v453_v16 = vadd.f32 %v452_v13, %v2180_v3 }
  0xfe   : > { %v456_v17 = vpop.f32.mrf.mxu0 }
  0xff   : > { %616 = vst [vmem:[#allocation2 + $0x8] sm:$0xfe] %v568_v14  ;;  %509 = vst [vmem:[%s2187_s30 + $0x10] sm:$0xff] %v493_v15  ;;  %v569_v18 = vrot.slane %v493_v15, 7  ;;  %v494_v19 = vmax.f32 %v453_v16, 0.0  ;;  %v457_v20 = vadd.f32 %v456_v17, %v2176_v2 }
 0x100   : > { %v458_v21 = vpop.f32.mrf.mxu0 }
 0x101   : > { %v2197_v22 = vsel %vm566_vm3, %v567_v10, %v569_v18  ;;  %619 = vst [vmem:[#allocation2 + $0x20] sm:$0x1] %v569_v18  ;;  %510 = vst [vmem:[%s2187_s30 + $0x18] sm:$0xff] %v494_v19  ;;  %v571_v23 = vrot.slane %v494_v19, 7  ;;  %v495_v24 = vmax.f32 %v457_v20, 0.0  ;;  %v459_v25 = vadd.f32 %v458_v21, %v2180_v3  ;;  %v991_v18 = vld [vmem:[%s2578_s3 + $0x4b0] sm:$0xff] }
 0x102   : > { %v462_v26 = vpop.f32.mrf.mxu0  ;;  %v697_v57 = vrot.slane %v2197_v22, 1 }
 0x103   : > { %v2202_v27 = vsel %vm566_vm3, %v568_v14, %v571_v23  ;;  %620 = vst [vmem:[#allocation2 + $0x28] sm:$0x1] %v571_v23  ;;  %511 = vst [vmem:[%s2187_s30 + $0x20] sm:$0xff] %v495_v24  ;;  %v573_v28 = vrot.slane %v495_v24, 7  ;;  %v496_v29 = vmax.f32 %v459_v25, 0.0  ;;  %v463_v30 = vadd.f32 %v462_v26, %v2176_v2  ;;  %v992_v14 = vld [vmem:[%s2578_s3 + $0x4b8] sm:$0xff] }
 0x104   : > { %v464_v31 = vpop.f32.mrf.mxu0  ;;  %v655_v35 = vld [vmem:[#allocation2] sm:$0xfe]  ;;  %v700_v48 = vrot.slane %v2202_v27, 1 }
 0x105   : > { %621 = vst [vmem:[#allocation2 + $0x30] sm:$0xfe] %v573_v28  ;;  %512 = vst [vmem:[%s2187_s30 + $0x28] sm:$0xff] %v496_v29  ;;  %v574_v32 = vrot.slane %v496_v29, 7  ;;  %v497_v33 = vmax.f32 %v463_v30, 0.0  ;;  %v465_v34 = vadd.f32 %v464_v31, %v2180_v3  ;;  %v639_v43 = vld [vmem:[#allocation2] sm:$0xff] }
 0x106   : > { %v468_v36 = vpop.f32.mrf.mxu0  ;;  %v640_v37 = vld [vmem:[#allocation2 + $0x8] sm:$0xff]  ;;  %v696_v49 = vrot.slane %v655_v35, 1 }
 0x107   : > { %v656_v39 = vld [vmem:[#allocation2 + $0x8] sm:$0xfe]  ;;  %622 = vst [vmem:[#allocation2 + $0x38] sm:$0xfe] %v574_v32  ;;  %513 = vst [vmem:[%s2187_s30 + $0x30] sm:$0xff] %v497_v33  ;;  %v575_v40 = vrot.slane %v497_v33, 7  ;;  %v469_v42 = vadd.f32 %v468_v36, %v2176_v2  ;;  %1109 = vmatprep.mubr.f32.mxu1 %v640_v37 }
 0x108   : > { %v498_v41 = vmax.f32 %v465_v34, 0.0  ;;  %v699_v45 = vrot.slane %v656_v39, 1  ;;  %v470_v46 = vpop.f32.mrf.mxu0  ;;  %1110 = vmatmul.mubr.f32.vlgmr.msra.gmra.mxu1 %v639_v43  ;;  %v657_v6 = vld [vmem:[#allocation2 + $0x20] sm:$0x1]  ;;  %v698_v9 = vsel %vm695_vm4, %v696_v49, %v697_v57  ;;  %v988_v37 = vld [vmem:[%s2578_s3 + $0x498] sm:$0xff]  ;;  %v986_v49 = vld [vmem:[%s2578_s3 + $0x488] sm:$0xff] }
 0x109   : > { %v2221_v50 = vsel %vm566_vm3, %v573_v28, %v575_v40  ;;  %625 = vst [vmem:[#allocation2 + $0x50] sm:$0x1] %v575_v40  ;;  %v499_v52 = vmax.f32 %v469_v42, 0.0  ;;  %v471_v53 = vadd.f32 %v470_v46, %v2180_v3  ;;  %1272 = vmatpush1.msra.mxu1 %v999_v38  ;;  %1115 = vmatprep.mubr.f32.mxu1 %v2202_v27  ;;  %v702_v21 = vrot.slane %v657_v6, 1  ;;  %v990_v28 = vld [vmem:[%s2578_s3 + $0x4a8] sm:$0xff]  ;;  %v987_v40 = vld [vmem:[%s2578_s3 + $0x490] sm:$0xff] }
 0x10a   : > { %514 = vst [vmem:[%s2187_s30 + $0x38] sm:$0xff] %v498_v41  ;;  %v577_v51 = vrot.slane %v498_v41, 7  ;;  %1273 = vmatprep.subr.mxu1 %v998_v44  ;;  %v474_v55 = vpop.f32.mrf.mxu0  ;;  %v701_v58 = vsel %vm695_vm4, %v699_v45, %v700_v48  ;;  %v658_v59 = vld [vmem:[#allocation2 + $0x28] sm:$0x1]  ;;  %v707_v41 = vrot.slane %v2221_v50, 1 }
 0x10b   : > { %515 = vst [vmem:[%s2187_s30 + $0x40] sm:$0xff] %v499_v52  ;;  %v579_v61 = vrot.slane %v499_v52, 7  ;;  %v500_v0 = vmax.f32 %v471_v53, 0.0  ;;  %v475_v4 = vadd.f32 %v474_v55, %v2176_v2  ;;  %1274 = vmatpush1.msra.mxu1 %v997_v47  ;;  %1222 = vmatprep.mubr.f32.mxu0 %v701_v58  ;;  %v704_v10 = vrot.slane %v658_v59, 1  ;;  %v985_v52 = vld [vmem:[%s2578_s3 + $0x480] sm:$0xff] }
 0x10c   : > { %v2235_v60 = vsel %vm566_vm3, %v574_v32, %v577_v51  ;;  %626 = vst [vmem:[#allocation2 + $0x58] sm:$0x1] %v577_v51  ;;  %1275 = vmatprep.subr.mxu1 %v996_v54  ;;  %v476_v7 = vpop.f32.mrf.mxu0  ;;  %1116 = vmatmul.mubr.f32.gmra.mxu1 %v2197_v22  ;;  %v643_v15 = vld [vmem:[#allocation2 + $0x30] sm:$0xff]  ;;  %v989_v32 = vld [vmem:[%s2578_s3 + $0x4a0] sm:$0xff]  ;;  %v703_v39 = vsel %vm695_vm4, %v697_v57, %v702_v21  ;;  %v984_v57 = vld [vmem:[%s2578_s3 + $0x478] sm:$0xff] }
 0x10d   : > { %627 = vst [vmem:[#allocation2 + $0x60] sm:$0xfe] %v579_v61  ;;  %516 = vst [vmem:[%s2187_s30 + $0x48] sm:$0xff] %v500_v0  ;;  %v580_v11 = vrot.slane %v500_v0, 7  ;;  %v501_v12 = vmax.f32 %v475_v4, 0.0  ;;  %v477_v13 = vadd.f32 %v476_v7, %v2180_v3  ;;  %1276 = vmatpush1.msra.mxu1 %v995_v56  ;;  %1223 = vmatmul.mubr.f32.vlgmr.msra.gmra.mxu0 %v698_v9  ;;  %v710_v20 = vrot.slane %v2235_v60, 1 }
 0x10e   : > { %1277 = vmatprep.subr.mxu1 %v994_v5  ;;  %v480_v16 = vpop.f32.mrf.mxu0  ;;  %v644_v17 = vld [vmem:[#allocation2 + $0x38] sm:$0xff]  ;;  %v705_v19 = vsel %vm695_vm4, %v700_v48, %v704_v10  ;;  %v659_v30 = vld [vmem:[#allocation2 + $0x30] sm:$0xfe]  ;;  %v981_v7 = vld [vmem:[%s2578_s3 + $0x460] sm:$0xff] }
 0x10f   : > { %v660_v23 = vld [vmem:[#allocation2 + $0x38] sm:$0xfe]  ;;  %628 = vst [vmem:[#allocation2 + $0x68] sm:$0xfe] %v580_v11  ;;  %517 = vst [vmem:[%s2187_s30 + $0x50] sm:$0xff] %v501_v12  ;;  %v581_v24 = vrot.slane %v501_v12, 7  ;;  %v481_v26 = vadd.f32 %v480_v16, %v2176_v2  ;;  %1278 = vmatpush1.msra.mxu1 %v993_v8  ;;  %1121 = vmatprep.mubr.f32.mxu1 %v644_v17 }
 0x110   : > { %v502_v25 = vmax.f32 %v477_v13, 0.0  ;;  %v709_v29 = vrot.slane %v660_v23, 1  ;;  %1279 = vmatprep.subr.mxu1 %v992_v14  ;;  %v482_v31 = vpop.f32.mrf.mxu0  ;;  %1122 = vmatmul.mubr.f32.gmra.mxu1 %v643_v15  ;;  %v706_v43 = vrot.slane %v659_v30, 1  ;;  %v661_v54 = vld [vmem:[#allocation2 + $0x50] sm:$0x1]  ;;  %v980_v12 = vld [vmem:[%s2578_s3 + $0x458] sm:$0xff] }
 0x111   : > { %v2268_v33 = vsel %vm566_vm3, %v579_v61, %v581_v24  ;;  %631 = vst [vmem:[#allocation2 + $0x80] sm:$0x1] %v581_v24  ;;  %v503_v35 = vmax.f32 %v481_v26, 0.0  ;;  %v483_v36 = vadd.f32 %v482_v31, %v2180_v3  ;;  %1280 = vmatpush1.msra.mxu1 %v991_v18  ;;  %1228 = vmatprep.mubr.f32.mxu0 %v705_v19  ;;  %v983_v61 = vld [vmem:[%s2578_s3 + $0x470] sm:$0xff]  ;;  %v712_v6 = vrot.slane %v661_v54, 1  ;;  %v978_v17 = vld [vmem:[%s2578_s3 + $0x448] sm:$0xff] }
 0x112   : > { %518 = vst [vmem:[%s2187_s30 + $0x58] sm:$0xff] %v502_v25  ;;  %v583_v34 = vrot.slane %v502_v25, 7  ;;  %1281 = vmatprep.subr.mxu1 %v990_v28  ;;  %v486_v38 = vpop.f32.mrf.mxu0  ;;  %1127 = vmatprep.mubr.f32.mxu1 %v2235_v60  ;;  %v711_v42 = vsel %vm695_vm4, %v709_v29, %v710_v20  ;;  %v708_v5 = vsel %vm695_vm4, %v706_v43, %v707_v41  ;;  %v979_v14 = vld [vmem:[%s2578_s3 + $0x450] sm:$0xff]  ;;  %v977_v21 = vld [vmem:[%s2578_s3 + $0x440] sm:$0xff]  ;;  %v976_v23 = vld [vmem:[%s2578_s3 + $0x438] sm:$0xff] }
 0x113   : > { %v662_v44 = vld [vmem:[#allocation2 + $0x58] sm:$0x1]  ;;  %519 = vst [vmem:[%s2187_s30 + $0x60] sm:$0xff] %v503_v35  ;;  %v585_v46 = vrot.slane %v503_v35, 7  ;;  %v504_v47 = vmax.f32 %v483_v36, 0.0  ;;  %v487_v48 = vadd.f32 %v486_v38, %v2176_v2  ;;  %1282 = vmatpush1.msra.mxu1 %v989_v32  ;;  %1229 = vmatmul.mubr.f32.gmra.mxu0 %v703_v39  ;;  %v713_v18 = vsel %vm695_vm4, %v707_v41, %v712_v6  ;;  %v975_v31 = vld [vmem:[%s2578_s3 + $0x430] sm:$0xff] }
 0x114   : > { %v2287_v45 = vsel %vm566_vm3, %v580_v11, %v583_v34  ;;  %632 = vst [vmem:[#allocation2 + $0x88] sm:$0x1] %v583_v34  ;;  %1283 = vmatprep.subr.mxu1 %v988_v37  ;;  %v488_v51 = vpop.f32.mrf.mxu0  ;;  %1128 = vmatmul.mubr.f32.gmra.mxu1 %v2221_v50  ;;  %v714_v53 = vrot.slane %v662_v44, 1  ;;  %v647_v58 = vld [vmem:[#allocation2 + $0x60] sm:$0xff]  ;;  %v753_v28 = vld [vmem:[#allocation2 + $0x8] sm:$0xfc] }
 0x115   : > { %633 = vst [vmem:[#allocation2 + $0x90] sm:$0xfe] %v585_v46  ;;  %520 = vst [vmem:[%s2187_s30 + $0x68] sm:$0xff] %v504_v47  ;;  %v586_v2 = vrot.slane %v504_v47, 7  ;;  %v505_v55 = vmax.f32 %v487_v48, 0.0  ;;  %v489_v56 = vadd.f32 %v488_v51, %v2180_v3  ;;  %1284 = vmatpush1.msra.mxu1 %v987_v40  ;;  %1234 = vmatprep.mubr.f32.mxu0 %v711_v42  ;;  %v982_v3 = vld [vmem:[%s2578_s3 + $0x468] sm:$0xff] }
 0x116   : > { %1285 = vmatprep.subr.mxu1 %v986_v49  ;;  %v648_v59 = vld [vmem:[#allocation2 + $0x68] sm:$0xff]  ;;  %v715_v8 = vsel %vm695_vm4, %v710_v20, %v714_v53  ;;  %v663_v13 = vld [vmem:[#allocation2 + $0x60] sm:$0xfe]  ;;  %v720_v16 = vrot.slane %v2287_v45, 1  ;;  %v717_v20 = vrot.slane %v2268_v33, 1  ;;  %v788_v38 = vrot.slane %v753_v28, 2 }
 0x117   : > { %634 = vst [vmem:[#allocation2 + $0x98] sm:$0xfe] %v586_v2  ;;  %521 = vst [vmem:[%s2187_s30 + $0x70] sm:$0xff] %v505_v55  ;;  %v587_v0 = vrot.slane %v505_v55, 7  ;;  %v506_v4 = vmax.f32 %v489_v56, 0.0  ;;  %1286 = vmatpush1.msra.mxu1 %v985_v52  ;;  %1133 = vmatprep.mubr.f32.mxu1 %v648_v59  ;;  %v716_v24 = vrot.slane %v663_v13, 1 }
 0x118   : > { %1287 = vmatprep.subr.mxu1 %v984_v57  ;;  %1134 = vmatmul.mubr.f32.gmra.mxu1 %v647_v58  ;;  %v664_v9 = vld [vmem:[#allocation2 + $0x68] sm:$0xfe]  ;;  %v665_v29 = vld [vmem:[#allocation2 + $0x80] sm:$0x1]  ;;  %v972_v41 = vld [vmem:[%s2578_s3 + $0x418] sm:$0xff] }
 0x119   : > { %v2320_v10 = vsel %vm566_vm3, %v585_v46, %v587_v0  ;;  %637 = vst [vmem:[#allocation2 + $0xb0] sm:$0x1] %v587_v0  ;;  %522 = vst [vmem:[%s2187_s30 + $0x78] sm:$0xff] %v506_v4  ;;  %v589_v11 = vrot.slane %v506_v4, 7  ;;  %1288 = vmatpush1.msra.mxu1 %v983_v61  ;;  %1139 = vmatprep.mubr.f32.mxu1 %v2287_v45  ;;  %v719_v19 = vrot.slane %v664_v9, 1  ;;  %v974_v34 = vld [vmem:[%s2578_s3 + $0x428] sm:$0xff]  ;;  %s2536_s30 = scalar_lea.vmem %s2581_s6, %s1633_s23 }
 0x11a   : > { %1289 = vmatprep.subr.mxu1 %v982_v3  ;;  %1235 = vmatmul.mubr.f32.gmra.mxu0 %v708_v5  ;;  %v973_v37 = vld [vmem:[%s2578_s3 + $0x420] sm:$0xff]  ;;  %v718_v39 = vsel %vm695_vm4, %v716_v24, %v717_v20  ;;  %v722_v40 = vrot.slane %v665_v29, 1  ;;  %v789_v46 = vrot.slane %v2202_v27, 2  ;;  %v971_v47 = vld [vmem:[%s2578_s3 + $0x410] sm:$0xff]  ;;  %v970_v49 = vld [vmem:[%s2578_s3 + $0x408] sm:$0xff]  ;;  %v727_v52 = vrot.slane %v2320_v10, 1 }
 0x11b   : > { %v2331_v15 = vsel %vm566_vm3, %v586_v2, %v589_v11  ;;  %638 = vst [vmem:[#allocation2 + $0xb8] sm:$0x1] %v589_v11  ;;  %1290 = vmatpush1.msra.mxu1 %v981_v7  ;;  %1240 = vmatprep.mubr.f32.mxu0 %v715_v8  ;;  %v666_v25 = vld [vmem:[#allocation2 + $0x88] sm:$0x1]  ;;  %v721_v35 = vsel %vm695_vm4, %v719_v19, %v720_v16  ;;  %v969_v53 = vld [vmem:[%s2578_s3 + $0x400] sm:$0xff]  ;;  %v1032_v56 = vld [vmem:[%s2578_s3 + $0x5f8] sm:$0xff] }
 0x11c   : > { %1291 = vmatprep.subr.mxu1 %v980_v12  ;;  %1140 = vmatmul.mubr.f32.gmra.mxu1 %v2268_v33  ;;  %v651_v26 = vld [vmem:[#allocation2 + $0x90] sm:$0xff]  ;;  %v724_v36 = vrot.slane %v666_v25, 1  ;;  %v730_v42 = vrot.slane %v2331_v15, 1  ;;  %v790_v54 = vsel %vm784_vm5, %v788_v38, %v789_v46  ;;  %v723_v2 = vsel %vm695_vm4, %v717_v20, %v722_v40  ;;  %v1030_v0 = vld [vmem:[%s2578_s3 + $0x5e8] sm:$0xff]  ;;  %v1029_v4 = vld [vmem:[%s2578_s3 + $0x5e0] sm:$0xff] }
 0x11d   : > { %1292 = vmatpush1.msra.mxu1 %v979_v14  ;;  %v667_v44 = vld [vmem:[#allocation2 + $0x90] sm:$0xfe]  ;;  %v1028_v6 = vld [vmem:[%s2578_s3 + $0x5d8] sm:$0xff]  ;;  %v1026_v9 = vld [vmem:[%s2578_s3 + $0x5c8] sm:$0xff] }
 0x11e   : > { %1293 = vmatprep.subr.mxu1 %v978_v17  ;;  %v652_v30 = vld [vmem:[#allocation2 + $0x98] sm:$0xff]  ;;  %1241 = vmatmul.mubr.f32.gmra.mxu0 %v713_v18  ;;  %v725_v51 = vsel %vm695_vm4, %v720_v16, %v724_v36  ;;  %v726_v55 = vrot.slane %v667_v44, 1  ;;  %v1031_v61 = vld [vmem:[%s2578_s3 + $0x5f0] sm:$0xff]  ;;  %v1025_v11 = vld [vmem:[%s2578_s3 + $0x5c0] sm:$0xff] }
 0x11f   : > { %v668_v32 = vld [vmem:[#allocation2 + $0x98] sm:$0xfe]  ;;  %1294 = vmatpush1.msra.mxu1 %v977_v21  ;;  %1145 = vmatprep.mubr.f32.mxu1 %v652_v30  ;;  %v1027_v8 = vld [vmem:[%s2578_s3 + $0x5d0] sm:$0xff]  ;;  %v1022_v16 = vld [vmem:[%s2578_s3 + $0x5a8] sm:$0xff] }
 0x120   : > { %1295 = vmatprep.subr.mxu1 %v976_v23  ;;  %1146 = vmatmul.mubr.f32.gmra.mxu1 %v651_v26  ;;  %v729_v43 = vrot.slane %v668_v32, 1  ;;  %v669_v59 = vld [vmem:[#allocation2 + $0xb0] sm:$0x1]  ;;  %v728_v3 = vsel %vm695_vm4, %v726_v55, %v727_v52  ;;  %v1024_v13 = vld [vmem:[%s2578_s3 + $0x5b8] sm:$0xff]  ;;  %v1021_v17 = vld [vmem:[%s2578_s3 + $0x5a0] sm:$0xff] }
 0x121   : > { %1296 = vmatpush1.msra.mxu1 %v975_v31  ;;  %1151 = vmatprep.mubr.f32.mxu1 %v2331_v15  ;;  %v732_v5 = vrot.slane %v669_v59, 1  ;;  %v1023_v14 = vld [vmem:[%s2578_s3 + $0x5b0] sm:$0xff]  ;;  %v1020_v18 = vld [vmem:[%s2578_s3 + $0x598] sm:$0xff]  ;;  %v1018_v20 = vld [vmem:[%s2578_s3 + $0x588] sm:$0xff] }
 0x122   : > { %1297 = vmatprep.subr.mxu1 %v974_v34  ;;  %1246 = vmatprep.mubr.f32.mxu0 %v721_v35  ;;  %v670_v48 = vld [vmem:[#allocation2 + $0xb8] sm:$0x1]  ;;  %v731_v57 = vsel %vm695_vm4, %v729_v43, %v730_v42  ;;  %v1019_v19 = vld [vmem:[%s2578_s3 + $0x590] sm:$0xff]  ;;  %v1017_v21 = vld [vmem:[%s2578_s3 + $0x580] sm:$0xff] }
 0x123   : > { %1298 = vmatpush1.msra.mxu1 %v973_v37  ;;  %1247 = vmatmul.mubr.f32.gmra.mxu0 %v718_v39  ;;  %v734_v58 = vrot.slane %v670_v48, 1  ;;  %v733_v12 = vsel %vm695_vm4, %v727_v52, %v732_v5  ;;  %v1016_v23 = vld [vmem:[%s2578_s3 + $0x578] sm:$0xff]  ;;  %v1015_v24 = vld [vmem:[%s2578_s3 + $0x570] sm:$0xff]  ;;  %v1014_v25 = vld [vmem:[%s2578_s3 + $0x568] sm:$0xff]  ;;  %v786_v48 = vrot.slane %v2197_v22, 2  ;;  %v796_v22 = vrot.slane %v2221_v50, 2 }
 0x124   : > { %1299 = vmatprep.subr.mxu1 %v972_v41  ;;  %1152 = vmatmul.mubr.f32.gmra.mxu1 %v2320_v10  ;;  %v1013_v26 = vld [vmem:[%s2578_s3 + $0x560] sm:$0xff]  ;;  %v1012_v28 = vld [vmem:[%s2578_s3 + $0x558] sm:$0xff]  ;;  %v1011_v29 = vld [vmem:[%s2578_s3 + $0x550] sm:$0xff] }
 0x125   : > { %1300 = vmatpush1.msra.mxu1 %v971_v47  ;;  %1335 = vmatprep.mubr.f32.mxu1 %v790_v54  ;;  %v735_v7 = vsel %vm695_vm4, %v730_v42, %v734_v58  ;;  %v1010_v30 = vld [vmem:[%s2578_s3 + $0x548] sm:$0xff]  ;;  %v1009_v31 = vld [vmem:[%s2578_s3 + $0x540] sm:$0xff]  ;;  %v1008_v32 = vld [vmem:[%s2578_s3 + $0x538] sm:$0xff] }
 0x126   : > { %1301 = vmatprep.subr.mxu1 %v970_v49  ;;  %1252 = vmatprep.mubr.f32.mxu0 %v725_v51  ;;  %v1007_v34 = vld [vmem:[%s2578_s3 + $0x530] sm:$0xff]  ;;  %v1006_v35 = vld [vmem:[%s2578_s3 + $0x528] sm:$0xff]  ;;  %v1005_v36 = vld [vmem:[%s2578_s3 + $0x520] sm:$0xff] }
 0x127   : > { %1302 = vmatpush1.msra.mxu1 %v969_v53  ;;  %1253 = vmatmul.mubr.f32.gmra.mxu0 %v723_v2  ;;  %v752_v37 = vld [vmem:[#allocation2] sm:$0xfc]  ;;  %v1004_v38 = vld [vmem:[%s2578_s3 + $0x518] sm:$0xff]  ;;  %v755_v39 = vld [vmem:[#allocation2 + $0x28] sm:$0x3]  ;;  %v799_v53 = vrot.slane %v2235_v60, 2 }
 0x128   : > { %1303 = vmatprep.subr.mxu1 %v1032_v56  ;;  %1258 = vmatprep.mubr.f32.mxu0 %v731_v57  ;;  %v1003_v40 = vld [vmem:[%s2578_s3 + $0x510] sm:$0xff]  ;;  %v1002_v41 = vld [vmem:[%s2578_s3 + $0x508] sm:$0xff]  ;;  %v785_v42 = vrot.slane %v752_v37, 2  ;;  %v1001_v43 = vld [vmem:[%s2578_s3 + $0x500] sm:$0xff]  ;;  %v793_v44 = vrot.slane %v755_v39, 2 }
 0x129   : > { %1304 = vmatpush2.msra.mxu1 %v1031_v61  ;;  %v754_v47 = vld [vmem:[#allocation2 + $0x20] sm:$0x3]  ;;  %v757_v49 = vld [vmem:[#allocation2 + $0x38] sm:$0xfc]  ;;  %v756_v55 = vld [vmem:[#allocation2 + $0x30] sm:$0xfc] }
 0x12a   : > { %1305 = vmatprep.subr.mxu1 %v1030_v0  ;;  %v787_v51 = vsel %vm784_vm5, %v785_v42, %v786_v48  ;;  %v791_v52 = vrot.slane %v754_v47, 2  ;;  %v794_v54 = vsel %vm784_vm5, %v789_v46, %v793_v44  ;;  %v798_v2 = vrot.slane %v757_v49, 2  ;;  %v759_v56 = vld [vmem:[#allocation2 + $0x58] sm:$0x3]  ;;  %v758_v0 = vld [vmem:[#allocation2 + $0x50] sm:$0x3] }
 0x12b   : > { %1306 = vmatpush2.msra.mxu1 %v1029_v4  ;;  %1259 = vmatmul.mubr.f32.gmra.mxu0 %v728_v3  ;;  %v795_v58 = vrot.slane %v756_v55, 2  ;;  %v803_v61 = vrot.slane %v759_v56, 2  ;;  %v761_v60 = vld [vmem:[#allocation2 + $0x68] sm:$0xfc]  ;;  %v801_v4 = vrot.slane %v758_v0, 2  ;;  %v809_v46 = vrot.slane %v2287_v45, 2 }
 0x12c   : > { %1307 = vmatprep.subr.mxu1 %v1028_v6  ;;  %1264 = vmatprep.mubr.f32.mxu0 %v735_v7  ;;  %v792_v57 = vsel %vm784_vm5, %v786_v48, %v791_v52  ;;  %v800_v59 = vsel %vm784_vm5, %v798_v2, %v799_v53  ;;  %v808_v5 = vrot.slane %v761_v60, 2  ;;  %v760_v50 = vld [vmem:[#allocation2 + $0x60] sm:$0xfc]  ;;  %v763_v6 = vld [vmem:[#allocation2 + $0x88] sm:$0x3]  ;;  %v806_v7 = vrot.slane %v2268_v33, 2 }
 0x12d   : > { %1308 = vmatpush2.msra.mxu1 %v1027_v8  ;;  %v797_v27 = vsel %vm784_vm5, %v795_v58, %v796_v22  ;;  %v804_v3 = vsel %vm784_vm5, %v799_v53, %v803_v61  ;;  %v802_v8 = vsel %vm784_vm5, %v796_v22, %v801_v4  ;;  %v764_v33 = vld [vmem:[#allocation2 + $0x90] sm:$0xfc] }
 0x12e   : > { %1309 = vmatprep.subr.mxu1 %v1026_v9  ;;  %v805_v9 = vrot.slane %v760_v50, 2 }
 0x12f   : > { %1310 = vmatpush2.msra.mxu1 %v1025_v11  ;;  %1265 = vmatmul.mubr.f32.gmra.mxu0 %v733_v12  ;;  %v810_v11 = vsel %vm784_vm5, %v808_v5, %v809_v46  ;;  %v813_v12 = vrot.slane %v763_v6, 2 }
 0x130   : > { %1311 = vmatprep.subr.mxu1 %v1024_v13  ;;  %v762_v13 = vld [vmem:[#allocation2 + $0x80] sm:$0x3]  ;;  %v807_v45 = vsel %vm784_vm5, %v805_v9, %v806_v7 }
 0x131   : > { %1312 = vmatpush2.msra.mxu1 %v1023_v14  ;;  %v765_v14 = vld [vmem:[#allocation2 + $0x98] sm:$0xfc] }
 0x132   : > { %1313 = vmatprep.subr.mxu1 %v1022_v16  ;;  %v811_v16 = vrot.slane %v762_v13, 2 }
 0x133   : > { %1314 = vmatpush2.msra.mxu1 %v1021_v17  ;;  %v819_v17 = vrot.slane %v2331_v15, 2 }
 0x134   : > { %1315 = vmatprep.subr.mxu1 %v1020_v18  ;;  %v814_v18 = vsel %vm784_vm5, %v809_v46, %v813_v12 }
 0x135   : > { %1316 = vmatpush2.msra.mxu1 %v1019_v19  ;;  %v818_v19 = vrot.slane %v765_v14, 2 }
 0x136   : > { %1317 = vmatprep.subr.mxu1 %v1018_v20  ;;  %v767_v20 = vld [vmem:[#allocation2 + $0xb8] sm:$0x3] }
 0x137   : > { %1318 = vmatpush2.msra.mxu1 %v1017_v21  ;;  %v816_v21 = vrot.slane %v2320_v10, 2 }
 0x138   : > { %1319 = vmatprep.subr.mxu1 %v1016_v23  ;;  %v812_v23 = vsel %vm784_vm5, %v806_v7, %v811_v16 }
 0x139   : > { %1320 = vmatpush2.msra.mxu1 %v1015_v24  ;;  %v815_v24 = vrot.slane %v764_v33, 2 }
 0x13a   : > { %1321 = vmatprep.subr.mxu1 %v1014_v25  ;;  %v820_v25 = vsel %vm784_vm5, %v818_v19, %v819_v17 }
 0x13b   : > { %1322 = vmatpush2.msra.mxu1 %v1013_v26  ;;  %v823_v26 = vrot.slane %v767_v20, 2  ;;  %v817_v15 = vsel %vm784_vm5, %v815_v24, %v816_v21 }
 0x13c   : > { %1323 = vmatprep.subr.mxu1 %v1012_v28  ;;  %v766_v28 = vld [vmem:[#allocation2 + $0xb0] sm:$0x3] }
 0x13d   : > { %1324 = vmatpush2.msra.mxu1 %v1011_v29  ;;  %v821_v29 = vrot.slane %v766_v28, 2 }
 0x13e   : > { %1325 = vmatprep.subr.mxu1 %v1010_v30  ;;  %v824_v30 = vsel %vm784_vm5, %v819_v17, %v823_v26 }
 0x13f   : > { %1326 = vmatpush2.msra.mxu1 %v1009_v31  ;;  %v822_v31 = vsel %vm784_vm5, %v816_v21, %v821_v29 }
 0x140   : > { %1327 = vmatprep.subr.mxu1 %v1008_v32 }
 0x141   : > { %1328 = vmatpush2.msra.mxu1 %v1007_v34 }
 0x142   : > { %1329 = vmatprep.subr.mxu1 %v1006_v35 }
 0x143   : > { %1330 = vmatpush2.msra.mxu1 %v1005_v36 }
 0x144   : > { %1331 = vmatprep.subr.mxu1 %v1004_v38 }
 0x145   : > { %1332 = vmatpush2.msra.mxu1 %v1003_v40 }
 0x146   : > { %1333 = vmatprep.subr.mxu1 %v1002_v41 }
 0x147   : > { %1334 = vmatpush2.msra.mxu1 %v1001_v43 }
 0x148   : > { %1336 = vmatmul.mubr.f32.vlgmr.msra.gmra.mxu1 %v787_v51 }
 0x149   : > { %1341 = vmatprep.mubr.f32.mxu1 %v794_v54  ;;  %v1033_v54 = vld [vmem:[%s2579_s4] sm:$0x3] }
 0x14a   : > { %v2518_v56 = vrot.slane %v1033_v54, %v338_v63  ;;  %v2522_v22 = vrot.slane %v1033_v54, %v342_v1 }
 0x14c   : > { %1342 = vmatmul.mubr.f32.gmra.mxu1 %v792_v57 }
 0x14d   : > { %1347 = vmatprep.mubr.f32.mxu1 %v800_v59 }
 0x150   : > { %1348 = vmatmul.mubr.f32.gmra.mxu1 %v797_v27 }
 0x151   : > { %1353 = vmatprep.mubr.f32.mxu1 %v804_v3 }
 0x154   : > { %1354 = vmatmul.mubr.f32.gmra.mxu1 %v802_v8 }
 0x155   : > { %1359 = vmatprep.mubr.f32.mxu1 %v810_v11 }
 0x158   : > { %1360 = vmatmul.mubr.f32.gmra.mxu1 %v807_v45 }
 0x159   : > { %1365 = vmatprep.mubr.f32.mxu1 %v814_v18 }
 0x15c   : > { %1366 = vmatmul.mubr.f32.gmra.mxu1 %v812_v23 }
 0x15d   : > { %1371 = vmatprep.mubr.f32.mxu1 %v820_v25 }
 0x160   : > { %1372 = vmatmul.mubr.f32.gmra.mxu1 %v817_v15 }
 0x161   : > { %1377 = vmatprep.mubr.f32.mxu1 %v824_v30 }
 0x164   : > { %1378 = vmatmul.mubr.f32.gmra.mxu1 %v822_v31 }
 0x1c8   : > { %v1111_v10 = vpop.f32.mrf.mxu1 }
 0x1c9   : > { %v1112_v59 = vadd.f32 %v1111_v10, %v2518_v56 }
 0x1ca   : > { %v1113_v32 = vpop.f32.mrf.mxu1 }
 0x1cb   : > { %v1114_v61 = vadd.f32 %v1113_v32, %v2522_v22 }
 0x1cc   : > { %v1117_v34 = vpop.f32.mrf.mxu1 }
 0x1cd   : > { %v1224_v40 = vpop.f32.mrf.mxu0  ;;  %v1118_v27 = vadd.f32 %v1117_v34, %v2518_v56 }
 0x1ce   : > { %v1119_v35 = vpop.f32.mrf.mxu1  ;;  %v1225_v4 = vadd.f32 %v1224_v40, %v1112_v59 }
 0x1cf   : > { %v1226_v42 = vpop.f32.mrf.mxu0  ;;  %v1120_v63 = vadd.f32 %v1119_v35, %v2522_v22 }
 0x1d0   : > { %v1123_v36 = vpop.f32.mrf.mxu1  ;;  %v1227_v3 = vadd.f32 %v1226_v42, %v1114_v61 }
 0x1d1   : > { %v1124_v6 = vadd.f32 %v1123_v36, %v2518_v56 }
 0x1d2   : > { %v1125_v37 = vpop.f32.mrf.mxu1 }
 0x1d3   : > { %v1230_v44 = vpop.f32.mrf.mxu0  ;;  %v1126_v12 = vadd.f32 %v1125_v37, %v2522_v22 }
 0x1d4   : > { %v1129_v38 = vpop.f32.mrf.mxu1  ;;  %v1231_v50 = vadd.f32 %v1230_v44, %v1118_v27 }
 0x1d5   : > { %v1232_v48 = vpop.f32.mrf.mxu0  ;;  %v1130_v18 = vadd.f32 %v1129_v38, %v2518_v56 }
 0x1d6   : > { %v1131_v39 = vpop.f32.mrf.mxu1  ;;  %v1233_v11 = vadd.f32 %v1232_v48, %v1120_v63 }
 0x1d7   : > { %v1132_v23 = vadd.f32 %v1131_v39, %v2522_v22 }
 0x1d8   : > { %v1135_v41 = vpop.f32.mrf.mxu1 }
 0x1d9   : > { %v1136_v29 = vadd.f32 %v1135_v41, %v2518_v56 }
 0x1da   : > { %v1137_v43 = vpop.f32.mrf.mxu1  ;;  %v1236_v49 = vpop.f32.mrf.mxu0 }
 0x1db   : > { %v1237_v17 = vadd.f32 %v1236_v49, %v1124_v6  ;;  %v1138_v34 = vadd.f32 %v1137_v43, %v2522_v22 }
 0x1dc   : > { %v2505_v47 = vpop.f32.mrf.mxu1  ;;  %v1238_v52 = vpop.f32.mrf.mxu0 }
 0x1dd   : > { %v1239_v21 = vadd.f32 %v1238_v52, %v1126_v12  ;;  %v1142_v40 = vadd.f32 %v2505_v47, %v2518_v56 }
 0x1de   : > { %v2507_v51 = vpop.f32.mrf.mxu1  ;;  %v1242_v2 = vpop.f32.mrf.mxu0 }
 0x1df   : > { %v1243_v15 = vadd.f32 %v1242_v2, %v1130_v18  ;;  %v1144_v49 = vadd.f32 %v2507_v51, %v2522_v22 }
 0x1e0   : > { %v2509_v53 = vpop.f32.mrf.mxu1  ;;  %v1244_v57 = vpop.f32.mrf.mxu0 }
 0x1e1   : > { %v1245_v32 = vadd.f32 %v1244_v57, %v1132_v23  ;;  %v1148_v59 = vadd.f32 %v2509_v53, %v2518_v56 }
 0x1e2   : > { %v2514_v55 = vpop.f32.mrf.mxu1 }
 0x1e3   : > { %v1248_v0 = vpop.f32.mrf.mxu0 }
 0x1e4   : > { %v2524_v58 = vpop.f32.mrf.mxu1  ;;  %v1249_v39 = vadd.f32 %v1248_v0, %v1136_v29 }
 0x1e5   : > { %v1250_v1 = vpop.f32.mrf.mxu0 }
 0x1e6   : > { %v2528_v60 = vpop.f32.mrf.mxu1  ;;  %v1251_v48 = vadd.f32 %v1250_v1, %v1138_v34  ;;  %v1154_v1 = vadd.f32 %v2524_v58, %v2518_v56 }
 0x1e7   : > { %v1254_v45 = vpop.f32.mrf.mxu0 }
 0x1e8   : > { %v1255_v57 = vadd.f32 %v1254_v45, %v1142_v40 }
 0x1e9   : > { %v1256_v26 = vpop.f32.mrf.mxu0 }
 0x1ea   : > { %v1257_v27 = vadd.f32 %v1256_v26, %v1144_v49 }
 0x1eb   : > { %v1260_v37 = vpop.f32.mrf.mxu0 }
 0x1ed   : > { %v1262_v54 = vpop.f32.mrf.mxu0 }
 0x1ef   : > { %v1266_v63 = vpop.f32.mrf.mxu0 }
 0x1f0   : > { %v1267_v12 = vadd.f32 %v1266_v63, %v1154_v1 }
 0x208   : > { %v1337_v46 = vpop.f32.mrf.mxu1 }
 0x209   : > { %v1338_v62 = vadd.f32 %v1337_v46, %v1225_v4  ;;  %v1150_v4 = vadd.f32 %v2514_v55, %v2522_v22 }
 0x20a   : > { %v1339_v5 = vpop.f32.mrf.mxu1 }
 0x20b   : > { %v1384_v7 = vmax.f32 %v1338_v62, 0.0  ;;  %v1340_v8 = vadd.f32 %v1339_v5, %v1227_v3  ;;  %v1261_v62 = vadd.f32 %v1260_v37, %v1148_v59  ;;  %v1263_v6 = vadd.f32 %v1262_v54, %v1150_v4 }
 0x20c   : > { %v1343_v9 = vpop.f32.mrf.mxu1 }
 0x20d   : > { %1400 = vst [vmem:[%s2536_s30] sm:$0xff] %v1384_v7  ;;  %v1385_v13 = vmax.f32 %v1340_v8, 0.0  ;;  %v1344_v14 = vadd.f32 %v1343_v9, %v1231_v50  ;;  %v1156_v7 = vadd.f32 %v2528_v60, %v2522_v22  ;;  %v1268_v9 = vpop.f32.mrf.mxu0 }
 0x20e   : > { %v1345_v16 = vpop.f32.mrf.mxu1 }
 0x20f   : > { %1401 = vst [vmem:[%s2536_s30 + $0x8] sm:$0xff] %v1385_v13  ;;  %v1386_v19 = vmax.f32 %v1344_v14, 0.0  ;;  %v1346_v33 = vadd.f32 %v1345_v16, %v1233_v11  ;;  %v1269_v14 = vadd.f32 %v1268_v9, %v1156_v7 }
 0x210   : > { %v1349_v20 = vpop.f32.mrf.mxu1 }
 0x211   : > { %1402 = vst [vmem:[%s2536_s30 + $0x10] sm:$0xff] %v1386_v19  ;;  %v1387_v24 = vmax.f32 %v1346_v33, 0.0  ;;  %v1350_v25 = vadd.f32 %v1349_v20, %v1237_v17 }
 0x212   : > { %v1351_v28 = vpop.f32.mrf.mxu1 }
 0x213   : > { %1403 = vst [vmem:[%s2536_s30 + $0x18] sm:$0xff] %v1387_v24  ;;  %v1388_v30 = vmax.f32 %v1350_v25, 0.0  ;;  %v1352_v31 = vadd.f32 %v1351_v28, %v1239_v21 }
 0x214   : > { %v1355_v10 = vpop.f32.mrf.mxu1 }
 0x215   : > { %1404 = vst [vmem:[%s2536_s30 + $0x20] sm:$0xff] %v1388_v30  ;;  %v1389_v35 = vmax.f32 %v1352_v31, 0.0  ;;  %v1356_v36 = vadd.f32 %v1355_v10, %v1243_v15 }
 0x216   : > { %v1357_v38 = vpop.f32.mrf.mxu1 }
 0x217   : > { %1405 = vst [vmem:[%s2536_s30 + $0x28] sm:$0xff] %v1389_v35  ;;  %v1390_v41 = vmax.f32 %v1356_v36, 0.0  ;;  %v1358_v42 = vadd.f32 %v1357_v38, %v1245_v32 }
 0x218   : > { %v1361_v44 = vpop.f32.mrf.mxu1 }
 0x219   : > { %1406 = vst [vmem:[%s2536_s30 + $0x30] sm:$0xff] %v1390_v41  ;;  %v1391_v43 = vmax.f32 %v1358_v42, 0.0  ;;  %v1362_v52 = vadd.f32 %v1361_v44, %v1249_v39 }
 0x21a   : > { %v1363_v2 = vpop.f32.mrf.mxu1 }
 0x21b   : > { %1407 = vst [vmem:[%s2536_s30 + $0x38] sm:$0xff] %v1391_v43  ;;  %v1392_v47 = vmax.f32 %v1362_v52, 0.0  ;;  %v1364_v61 = vadd.f32 %v1363_v2, %v1251_v48 }
 0x21c   : > { %v1367_v0 = vpop.f32.mrf.mxu1 }
 0x21d   : > { %1408 = vst [vmem:[%s2536_s30 + $0x40] sm:$0xff] %v1392_v47  ;;  %v1393_v51 = vmax.f32 %v1364_v61, 0.0  ;;  %v1368_v46 = vadd.f32 %v1367_v0, %v1255_v57 }
 0x21e   : > { %v1369_v3 = vpop.f32.mrf.mxu1 }
 0x21f   : > { %1409 = vst [vmem:[%s2536_s30 + $0x48] sm:$0xff] %v1393_v51  ;;  %v1394_v53 = vmax.f32 %v1368_v46, 0.0  ;;  %v1370_v5 = vadd.f32 %v1369_v3, %v1257_v27 }
 0x220   : > { %v1373_v50 = vpop.f32.mrf.mxu1 }
 0x221   : > { %1410 = vst [vmem:[%s2536_s30 + $0x50] sm:$0xff] %v1394_v53  ;;  %v1395_v55 = vmax.f32 %v1370_v5, 0.0  ;;  %v1374_v8 = vadd.f32 %v1373_v50, %v1261_v62 }
 0x222   : > { %v1375_v11 = vpop.f32.mrf.mxu1 }
 0x223   : > { %1411 = vst [vmem:[%s2536_s30 + $0x58] sm:$0xff] %v1395_v55  ;;  %v1396_v56 = vmax.f32 %v1374_v8, 0.0  ;;  %v1376_v58 = vadd.f32 %v1375_v11, %v1263_v6 }
 0x224   : > { %v1379_v13 = vpop.f32.mrf.mxu1 }
 0x225   : > { %1412 = vst [vmem:[%s2536_s30 + $0x60] sm:$0xff] %v1396_v56  ;;  %v1397_v45 = vmax.f32 %v1376_v58, 0.0  ;;  %v1380_v16 = vadd.f32 %v1379_v13, %v1267_v12 }
 0x226   : > { %v1381_v17 = vpop.f32.mrf.mxu1 }
 0x227   : > { %1413 = vst [vmem:[%s2536_s30 + $0x68] sm:$0xff] %v1397_v45  ;;  %v1398_v22 = vmax.f32 %v1380_v16, 0.0  ;;  %v1382_v60 = vadd.f32 %v1381_v17, %v1269_v14 }
 0x229   : > { %1414 = vst [vmem:[%s2536_s30 + $0x70] sm:$0xff] %v1398_v22  ;;  %v1399_v18 = vmax.f32 %v1382_v60, 0.0 }
 0x22b   : > { %1415 = vst [vmem:[%s2536_s30 + $0x78] sm:$0xff] %v1399_v18 }
 0x22c PF: > { %s17_s21 = sadd.s32 1, %s1554_s21  }
 0x22d   : > { %p14_p4 = scmp.ge.s32.totalorder %s17_s21, 4  }
 0x22f   :  { %16 = sbr.rel (!%p14_p4) target bundleno = 1 (0x1), region = 89 }

</bundles_post_ra>
